<compile_context>
chip_gen: v5e
topology: v5e:2x2
jax: 0.10.0
libtpu: 0.0.40
codegen_flags: <defaults>
</compile_context>

<pallas_src>
import functools

import jax
import jax.numpy as jnp
import numpy as np
from jax.experimental import pallas as pl
from jax.experimental.pallas import tpu as pltpu


def _pick_row_tile(hout, wp2, cin, cp, budget_bytes=5 * 1024 * 1024):
    # Per output row: double-buffered bf16 input row + double-buffered f32/out-dtype row.
    per_row = 2 * (wp2 * cin * 2) + 2 * (wp2 * cp * 4)
    th = max(1, budget_bytes // max(per_row, 1))
    return int(min(hout, th))


def upsample_block(x, weight, bias, alpha, scale_factor, *, row_tile=None):
    """x: (N, Cin, H, W) NCHW; weight: (Cout, Cin, 2, 2) OIHW; bias: (Cout,); alpha: (Cin,)."""
    N, Cin, H, W = x.shape
    r = int(scale_factor)
    KH = KW = 2
    Cout = Cin * r * r
    assert weight.shape == (Cout, Cin, KH, KW)
    assert bias.shape == (Cout,) and alpha.shape == (Cin,)
    Hout, Wout = H + 1, W + 1            # kernel 2, stride 1, padding 1
    Wp2 = W + 2
    Cp = ((Cout + 127) // 128) * 128     # lane-dense (unmasked) output stores

    # ---- layout glue: NHWC, zero halo pad, bf16 for the MXU (single cheap pass) ----
    x_pad = jnp.pad(jnp.transpose(x, (0, 2, 3, 1)),
                    ((0, 0), (1, 1), (1, 1), (0, 0))).astype(jnp.bfloat16)

    th = row_tile or _pick_row_tile(Hout, Wp2, Cin, Cp)
    nrt = pl.cdiv(Hout, th)
    # Pad rows so every tile owns th+1 padded rows (1-row halo at the bottom).
    x_pad = jnp.pad(x_pad, ((0, 0), (0, nrt * th - Hout), (0, 0), (0, 0)))
    if nrt == 1:
        x_blk = x_pad.reshape(N, (th + 1) * Wp2, Cin)
    else:
        # Overlapping row windows (~(th+1)/th extra bytes, not 4x im2col).
        x_blk = jnp.stack(
            [x_pad[:, t * th:t * th + th + 1] for t in range(nrt)], axis=1
        ).reshape(N * nrt, (th + 1) * Wp2, Cin)

    Lo = th * Wp2                                      # flattened outputs per tile
    Lin = ((Lo + Wp2 + 1 + 7) // 8) * 8                # covers max tap offset Wp2+1
    x_blk = jnp.pad(x_blk, ((0, 0), (0, Lin - x_blk.shape[1]), (0, 0)))

    # Tap-major weights: w_taps[kh*2+kw] is the (Cin, Cp) matrix of tap (kh, kw).
    w_taps = jnp.transpose(weight, (2, 3, 1, 0)).reshape(KH * KW, Cin, Cout)
    w_taps = jnp.pad(w_taps.astype(jnp.bfloat16), ((0, 0), (0, 0), (0, Cp - Cout)))
    b_row = jnp.pad(bias.astype(jnp.float32).reshape(1, Cout), ((0, 0), (0, Cp - Cout)))
    # PReLU applied pre-shuffle is exact: alpha[cout // r^2] is the per-image-channel alpha.
    a_row = jnp.pad(jnp.repeat(alpha.astype(jnp.float32), r * r).reshape(1, Cout),
                    ((0, 0), (0, Cp - Cout)))

    def kernel(x_ref, w_ref, b_ref, a_ref, o_ref):
        # x_ref: (Lin, Cin) bf16 (flattened padded rows) | w_ref: (4, Cin, Cp) bf16
        # b_ref/a_ref: (1, Cp) f32                       | o_ref: (Lo, Cp) out dtype
        acc = jnp.dot(x_ref[pl.ds(0, Lo), :], w_ref[0],
                      preferred_element_type=jnp.float32)              # tap (0,0)
        acc = acc + jnp.dot(x_ref[pl.ds(1, Lo), :], w_ref[1],
                            preferred_element_type=jnp.float32)        # tap (0,1)
        acc = acc + jnp.dot(x_ref[pl.ds(Wp2, Lo), :], w_ref[2],
                            preferred_element_type=jnp.float32)        # tap (1,0)
        acc = acc + jnp.dot(x_ref[pl.ds(Wp2 + 1, Lo), :], w_ref[3],
                            preferred_element_type=jnp.float32)        # tap (1,1)
        y = acc + b_ref[...]
        y = jnp.where(y >= 0.0, y, a_ref[...] * y)                     # PReLU in f32
        o_ref[...] = y.astype(o_ref.dtype)

    G = x_blk.shape[0]
    flops = 2 * G * Lo * Cin * Cp * (KH * KW)
    bytes_accessed = (x_blk.size * 2 + w_taps.size * 2 + b_row.size * 4 + a_row.size * 4
                      + G * Lo * Cp * x.dtype.itemsize)

    out = pl.pallas_call(
        kernel,
        out_shape=jax.ShapeDtypeStruct((G, Lo, Cp), x.dtype),
        grid=(G,),
        in_specs=[
            pl.BlockSpec((None, Lin, Cin), lambda i: (i, 0, 0)),
            pl.BlockSpec((KH * KW, Cin, Cp), lambda i: (0, 0, 0)),
            pl.BlockSpec((1, Cp), lambda i: (0, 0)),
            pl.BlockSpec((1, Cp), lambda i: (0, 0)),
        ],
        out_specs=pl.BlockSpec((None, Lo, Cp), lambda i: (i, 0, 0)),
        compiler_params=pltpu.CompilerParams(dimension_semantics=("parallel",)),
        cost_estimate=pl.CostEstimate(flops=flops, transcendentals=0,
                                      bytes_accessed=bytes_accessed),
    )(x_blk, w_taps, b_row, a_row)

    # ---- drop junk column / padding, pixel shuffle (pure layout), back to NCHW ----
    y = out.reshape(N, nrt, th, Wp2, Cp)[:, :, :, :Wout, :Cout]
    y = y.reshape(N, nrt * th, Wout, Cout)[:, :Hout]
    y = y.reshape(N, Hout, Wout, Cin, r, r)                  # cout -> (c, i, j)
    y = jnp.transpose(y, (0, 3, 1, 4, 2, 5))                 # (N, C, Hout, r, Wout, r)
    return y.reshape(N, Cin, Hout * r, Wout * r).astype(x.dtype)


def reference(x, weight, bias, alpha, r):
    """Pure-JAX reference mirroring the PyTorch module. Inputs rounded to bf16 to match
    the kernel's MXU operand precision; accumulation is f32 in both paths."""
    xq = x.astype(jnp.bfloat16).astype(jnp.float32)
    wq = weight.astype(jnp.bfloat16).astype(jnp.float32)
    y = jax.lax.conv_general_dilated(
        xq, wq, window_strides=(1, 1), padding=((1, 1), (1, 1)),
        dimension_numbers=('NCHW', 'OIHW', 'NCHW'),
        preferred_element_type=jnp.float32)
    y = y + bias[None, :, None, None]
    N, C, H2, W2 = y.shape
    Cin = C // (r * r)
    y = y.reshape(N, Cin, r, r, H2, W2)
    y = jnp.transpose(y, (0, 1, 4, 2, 5, 3)).reshape(N, Cin, H2 * r, W2 * r)
    a = alpha[None, :, None, None]
    return jnp.where(y >= 0, y, a * y)


if __name__ == "__main__":
    key = jax.random.PRNGKey(0)
    k1, k2, k3, k4 = jax.random.split(key, 4)

    N, Cin, H, W = 2, 8, 16, 16
    r = 2
    Cout = Cin * r * r

    x = jax.random.normal(k1, (N, Cin, H, W), jnp.float32)
    weight = jax.random.normal(k2, (Cout, Cin, 2, 2), jnp.float32) * 0.1
    bias = jax.random.normal(k3, (Cout,), jnp.float32) * 0.1
    alpha = jax.random.uniform(k4, (Cin,), jnp.float32, minval=0.1, maxval=0.4)

    fwd = jax.jit(functools.partial(upsample_block, scale_factor=r))
    out = jax.block_until_ready(fwd(x, weight, bias, alpha))

    assert out.shape == (N, Cin, (H + 1) * r, (W + 1) * r), out.shape
    ref = jax.block_until_ready(reference(x, weight, bias, alpha, r))
    np.testing.assert_allclose(np.asarray(out), np.asarray(ref), rtol=1e-3, atol=1e-3)
    print("KERNEL_OK")
</pallas_src>

<mosaic_0001>
module attributes {stable_mosaic.version = 11 : i64} {
  func.func @kernel(%arg0: i32, %arg1: memref<1x328x8xbf16, #tpu.memory_space<vmem>>, %arg2: memref<4x8x128xbf16, #tpu.memory_space<vmem>>, %arg3: memref<1x128xf32, #tpu.memory_space<vmem>>, %arg4: memref<1x128xf32, #tpu.memory_space<vmem>>, %arg5: memref<1x306x128xf32, #tpu.memory_space<vmem>>) attributes {dimension_semantics = [#tpu.dimension_semantics<parallel>], iteration_bounds = array<i64: 2>, scalar_prefetch = 0 : i64, scratch_operands = 0 : i64, tpu.core_type = #tpu.core_type<tc>, window_params = [{transform_indices = @transform_0, window_bounds = array<i64: 1, 328, 8>}, {pipeline_mode = #tpu.pipeline_mode<synchronous>, transform_indices = @transform_1, window_bounds = array<i64: 4, 8, 128>}, {pipeline_mode = #tpu.pipeline_mode<synchronous>, transform_indices = @transform_2, window_bounds = array<i64: 1, 128>}, {pipeline_mode = #tpu.pipeline_mode<synchronous>, transform_indices = @transform_3, window_bounds = array<i64: 1, 128>}, {transform_indices = @transform_4, window_bounds = array<i64: 1, 306, 128>}]} {
    %c0 = arith.constant 0 : index
    %c0_0 = arith.constant 0 : index
    %c0_1 = arith.constant 0 : index
    %0 = vector.load %arg1[%c0, %c0_0, %c0_1] : memref<1x328x8xbf16, #tpu.memory_space<vmem>>, vector<1x306x8xbf16>
    %1 = vector.shape_cast %0 : vector<1x306x8xbf16> to vector<306x8xbf16>
    %c0_2 = arith.constant 0 : index
    %c0_3 = arith.constant 0 : index
    %c0_4 = arith.constant 0 : index
    %2 = vector.load %arg2[%c0_2, %c0_3, %c0_4] : memref<4x8x128xbf16, #tpu.memory_space<vmem>>, vector<1x8x128xbf16>
    %3 = vector.shape_cast %2 : vector<1x8x128xbf16> to vector<8x128xbf16>
    %cst = arith.constant dense<0.000000e+00> : vector<306x128xf32>
    %4 = tpu.matmul %1, %3, %cst {dimension_numbers = #tpu.dot_dimension_numbers<[1], [0], [0], [1], [0, 0, 1, 1], [], []>} : vector<306x8xbf16>, vector<8x128xbf16>, vector<306x128xf32> -> vector<306x128xf32>
    %c0_5 = arith.constant 0 : index
    %c1 = arith.constant 1 : index
    %c0_6 = arith.constant 0 : index
    %5 = vector.load %arg1[%c0_5, %c1, %c0_6] : memref<1x328x8xbf16, #tpu.memory_space<vmem>>, vector<1x306x8xbf16>
    %6 = vector.shape_cast %5 : vector<1x306x8xbf16> to vector<306x8xbf16>
    %c1_7 = arith.constant 1 : index
    %c0_8 = arith.constant 0 : index
    %c0_9 = arith.constant 0 : index
    %7 = vector.load %arg2[%c1_7, %c0_8, %c0_9] : memref<4x8x128xbf16, #tpu.memory_space<vmem>>, vector<1x8x128xbf16>
    %8 = vector.shape_cast %7 : vector<1x8x128xbf16> to vector<8x128xbf16>
    %cst_10 = arith.constant dense<0.000000e+00> : vector<306x128xf32>
    %9 = tpu.matmul %6, %8, %cst_10 {dimension_numbers = #tpu.dot_dimension_numbers<[1], [0], [0], [1], [0, 0, 1, 1], [], []>} : vector<306x8xbf16>, vector<8x128xbf16>, vector<306x128xf32> -> vector<306x128xf32>
    %10 = arith.addf %4, %9 : vector<306x128xf32>
    %c0_11 = arith.constant 0 : index
    %c18 = arith.constant 18 : index
    %c0_12 = arith.constant 0 : index
    %11 = vector.load %arg1[%c0_11, %c18, %c0_12] : memref<1x328x8xbf16, #tpu.memory_space<vmem>>, vector<1x306x8xbf16>
    %12 = vector.shape_cast %11 : vector<1x306x8xbf16> to vector<306x8xbf16>
    %c2 = arith.constant 2 : index
    %c0_13 = arith.constant 0 : index
    %c0_14 = arith.constant 0 : index
    %13 = vector.load %arg2[%c2, %c0_13, %c0_14] : memref<4x8x128xbf16, #tpu.memory_space<vmem>>, vector<1x8x128xbf16>
    %14 = vector.shape_cast %13 : vector<1x8x128xbf16> to vector<8x128xbf16>
    %cst_15 = arith.constant dense<0.000000e+00> : vector<306x128xf32>
    %15 = tpu.matmul %12, %14, %cst_15 {dimension_numbers = #tpu.dot_dimension_numbers<[1], [0], [0], [1], [0, 0, 1, 1], [], []>} : vector<306x8xbf16>, vector<8x128xbf16>, vector<306x128xf32> -> vector<306x128xf32>
    %16 = arith.addf %10, %15 : vector<306x128xf32>
    %c0_16 = arith.constant 0 : index
    %c19 = arith.constant 19 : index
    %c0_17 = arith.constant 0 : index
    %17 = vector.load %arg1[%c0_16, %c19, %c0_17] : memref<1x328x8xbf16, #tpu.memory_space<vmem>>, vector<1x306x8xbf16>
    %18 = vector.shape_cast %17 : vector<1x306x8xbf16> to vector<306x8xbf16>
    %c3 = arith.constant 3 : index
    %c0_18 = arith.constant 0 : index
    %c0_19 = arith.constant 0 : index
    %19 = vector.load %arg2[%c3, %c0_18, %c0_19] : memref<4x8x128xbf16, #tpu.memory_space<vmem>>, vector<1x8x128xbf16>
    %20 = vector.shape_cast %19 : vector<1x8x128xbf16> to vector<8x128xbf16>
    %cst_20 = arith.constant dense<0.000000e+00> : vector<306x128xf32>
    %21 = tpu.matmul %18, %20, %cst_20 {dimension_numbers = #tpu.dot_dimension_numbers<[1], [0], [0], [1], [0, 0, 1, 1], [], []>} : vector<306x8xbf16>, vector<8x128xbf16>, vector<306x128xf32> -> vector<306x128xf32>
    %22 = arith.addf %16, %21 : vector<306x128xf32>
    %c0_21 = arith.constant 0 : index
    %c0_22 = arith.constant 0 : index
    %23 = vector.load %arg3[%c0_21, %c0_22] : memref<1x128xf32, #tpu.memory_space<vmem>>, vector<1x128xf32>
    %24 = vector.broadcast %23 : vector<1x128xf32> to vector<306x128xf32>
    %25 = arith.addf %22, %24 : vector<306x128xf32>
    %cst_23 = arith.constant 0.000000e+00 : f32
    %26 = vector.broadcast %cst_23 : f32 to vector<306x128xf32>
    %27 = arith.cmpf oge, %25, %26 : vector<306x128xf32>
    %c0_24 = arith.constant 0 : index
    %c0_25 = arith.constant 0 : index
    %28 = vector.load %arg4[%c0_24, %c0_25] : memref<1x128xf32, #tpu.memory_space<vmem>>, vector<1x128xf32>
    %29 = vector.broadcast %28 : vector<1x128xf32> to vector<306x128xf32>
    %30 = arith.mulf %29, %25 : vector<306x128xf32>
    %31 = arith.select %27, %25, %30 : vector<306x128xi1>, vector<306x128xf32>
    %c0_26 = arith.constant 0 : index
    %c0_27 = arith.constant 0 : index
    %c0_28 = arith.constant 0 : index
    %32 = vector.load %arg5[%c0_26, %c0_27, %c0_28] : memref<1x306x128xf32, #tpu.memory_space<vmem>>, vector<1x306x128xf32>
    %33 = vector.shape_cast %32 : vector<1x306x128xf32> to vector<306x128xf32>
    %34 = vector.shape_cast %31 : vector<306x128xf32> to vector<1x306x128xf32>
    tpu.vector_store %arg5[%c0_26, %c0_27, %c0_28], %34 {strides = array<i32>} : memref<1x306x128xf32, #tpu.memory_space<vmem>>, vector<1x306x128xf32>,
    return
  }
  func.func @transform_0(%arg0: i32) -> (i32, i32, i32) {
    %c0_i32 = arith.constant 0 : i32
    %c0_i32_0 = arith.constant 0 : i32
    %c0_i32_1 = arith.constant 0 : i32
    return %arg0, %c0_i32, %c0_i32_0 : i32, i32, i32
  }
  func.func @transform_1(%arg0: i32) -> (i32, i32, i32) {
    %c0_i32 = arith.constant 0 : i32
    %c0_i32_0 = arith.constant 0 : i32
    %c0_i32_1 = arith.constant 0 : i32
    %c0_i32_2 = arith.constant 0 : i32
    return %c0_i32, %c0_i32_0, %c0_i32_1 : i32, i32, i32
  }
  func.func @transform_2(%arg0: i32) -> (i32, i32) {
    %c0_i32 = arith.constant 0 : i32
    %c0_i32_0 = arith.constant 0 : i32
    %c0_i32_1 = arith.constant 0 : i32
    return %c0_i32, %c0_i32_0 : i32, i32
  }
  func.func @transform_3(%arg0: i32) -> (i32, i32) {
    %c0_i32 = arith.constant 0 : i32
    %c0_i32_0 = arith.constant 0 : i32
    %c0_i32_1 = arith.constant 0 : i32
    return %c0_i32, %c0_i32_0 : i32, i32
  }
  func.func @transform_4(%arg0: i32) -> (i32, i32, i32) {
    %c0_i32 = arith.constant 0 : i32
    %c0_i32_0 = arith.constant 0 : i32
    %c0_i32_1 = arith.constant 0 : i32
    return %arg0, %c0_i32, %c0_i32_0 : i32, i32, i32
  }
}

</mosaic_0001>

<bundles_post_ra>
// kernel: upsample_block.1
= control target key start
LH: loop header
LB: loop body
LE: loop exit
PB: predicated region body
PF: predicated region fallthrough
CT: control target
= control target key end

     0   :  { %s2200_s15 = smov 0   ;;  %s2651_s0 = inlined_call_operand.vmem [shape: bf16[2,328,8], index: 0, kind: input, shape index: {}]   ;;  %s2652_s1 = inlined_call_operand.vmem [shape: bf16[4,8,128], index: 1, kind: input, shape index: {}]   ;;  %s2653_s2 = inlined_call_operand.vmem [shape: f32[1,128], index: 2, kind: input, shape index: {}]   ;;  %s2654_s3 = inlined_call_operand.vmem [shape: f32[1,128], index: 3, kind: input, shape index: {}]   ;;  %s2655_s4 = inlined_call_operand.vmem [shape: f32[2,306,128], index: 4, kind: output, shape index: {}]  }
   0x1 LB: > { %s1871_s16 = sadd.s32 4294967295, %s2173_s15   ;;  %p1875_p0 = scmp.ge.s32.totalorder %s2173_s15, 1  ;;  %s2173_s15 = sphi %s2200_s15, %s14_s15  }
   0x2   : > { %p162_p1 = scmp.lt.s32.totalorder %s2173_s15, 3 }
   0x4   : > { %p163_p2 = pnand %p1875_p0, %p162_p1 }
   0x5   : > { %p188_p3 = scmp.lt.s32.totalorder (!%p163_p2), %s1871_s16, 1 }
   0x6   : > { %166 = sbr.rel (%p163_p2) target bundleno = 470 (0x1d6), region = 36 }
   0xb   : > { %v238_v0 = vld [vmem:[%s2652_s1] sm:$0xf]  ;;  %vm561_vm0 = vcmask 1043456   ;;  %v1995_v1 = vld [vmem:[%s2652_s1 + $0x8] sm:$0xf]  ;;  %s2657_s16 = smov (!%p188_p3, %s1871_s16), 1 }
   0xc   : > { %v718_v2 = vsel %vm561_vm0, %v238_v0, 0  ;;  %v1068_v3 = vsel %vm561_vm0, %v1995_v1, 0  ;;  %v1878_v4 = vld [vmem:[%s2652_s1 + $0x4] sm:$0xf]  ;;  %v2092_v6 = vld [vmem:[%s2652_s1 + $0xc] sm:$0xf] }
   0xd   : > { %727 = vmatpush.bf16.msra.mxu1 %v718_v2  ;;  %1077 = vmatpush.bf16.msra.mxu2 %v1068_v3  ;;  %v563_v5 = vsel %vm561_vm0, %v1878_v4, 0  ;;  %v1464_v7 = vsel %vm561_vm0, %v2092_v6, 0  ;;  %s2153_s25 = smul.u32 164, %s2657_s16  ;;  %vm500_vm1 = vcmask 64512   ;;  %vm967_vm2 = vcmask 1046528  }
   0xe   : > { %572 = vmatpush.bf16.msra.mxu0 %v563_v5  ;;  %1473 = vmatpush.bf16.msra.mxu3 %v1464_v7  ;;  %vm340_vm3 = vsmask.f32 7424  ;;  %vm1223_vm4 = vsmask.f32 6400  ;;  %s2154_s5 = smul.u32 312, %s2657_s16 }
   0xf   : > { %s2226_s28 = scalar_lea.vmem %s2651_s0, %s2153_s25 }
  0x10   : > { %v2115_v8 = vld [vmem:[%s2226_s28] sm:$0xff]  ;;  %v1998_v9 = vld [vmem:[%s2226_s28 + $0x8] sm:$0xe]  ;;  %v2134_v10 = vld [vmem:[%s2226_s28 + $0x8] sm:$0xf0]  ;;  %s2338_s10 = scalar_lea.vmem %s2655_s4, %s2154_s5 }
  0x11   : > { %v2135_v11 = vld [vmem:[%s2226_s28 + $0x10] sm:$0xff]  ;;  %v1999_v12 = vor.u32 %v2134_v10, %v1998_v9  ;;  %v2116_v13 = vld [vmem:[%s2226_s28 + $0x8] sm:$0xff]  ;;  %v344_v14 = vshll.u32 %v2115_v8, 16  ;;  %1975 = vmatmul.msk.bf16.vlgmr.msra.gmra.mxu1 %vm500_vm1, %v2115_v8  ;;  %v342_v15 = vshrl.u32 %v2115_v8, 16  ;;  %v2136_v34 = vld [vmem:[%s2226_s28 + $0x18] sm:$0xff] }
  0x12   : > { %v969_v17 = vrot.slane %v2135_v11, 1  ;;  %v349_v18 = vshll.u32 %v2116_v13, 16  ;;  %v1233_v22 = vshrl.u32 %v2135_v11, 16  ;;  %v1236_v23 = vshll.u32 %v2135_v11, 16  ;;  %v2117_v36 = vld [vmem:[%s2226_s28 + $0x10] sm:$0xff]  ;;  %v2137_v50 = vld [vmem:[%s2226_s28 + $0x20] sm:$0xff] }
  0x13   : > { %v968_v16 = vrot.slane %v1999_v12, 1  ;;  %v1225_v19 = vshrl.u32 %v1999_v12, 16  ;;  %v346_v20 = vrot.slane %v344_v14, 1  ;;  %v1228_v21 = vshll.u32 %v1999_v12, 16  ;;  %v2118_v51 = vld [vmem:[%s2226_s28 + $0x18] sm:$0xff]  ;;  %v2138_v1 = vld [vmem:[%s2226_s28 + $0x28] sm:$0xff] }
  0x14   : > { %v351_v25 = vrot.slane %v349_v18, 1  ;;  %v1235_v29 = vrot.slane %v1233_v22, 1  ;;  %v1238_v30 = vrot.slane %v1236_v23, 2  ;;  %v1242_v37 = vshrl.u32 %v2136_v34, 16  ;;  %v2119_v2 = vld [vmem:[%s2226_s28 + $0x20] sm:$0xff] }
  0x15   : > { %v970_v24 = vsel %vm967_vm2, %v968_v16, %v969_v17  ;;  %v1227_v26 = vrot.slane %v1225_v19, 1  ;;  %v347_v27 = vor.u32 %v346_v20, %v342_v15  ;;  %v1230_v28 = vrot.slane %v1228_v21, 2  ;;  %v2139_v16 = vld [vmem:[%s2226_s28 + $0x30] sm:$0xff] }
  0x16   : > { %2072 = vmatmul.msk.bf16.vlgmr.msra.gmra.mxu2 %vm500_vm1, %v970_v24  ;;  %v1239_v33 = vor.u32 %v1238_v30, %v1235_v29  ;;  %v1245_v38 = vshll.u32 %v2136_v34, 16  ;;  %v353_v39 = vshrl.u32 %v2116_v13, 16  ;;  %v357_v40 = vshll.u32 %v2117_v36, 16 }
  0x17   : > { %v352_v31 = vsel %vm340_vm3, %v347_v27, %v351_v25  ;;  %v1231_v32 = vor.u32 %v1230_v28, %v1227_v26  ;;  %v971_v41 = vrot.slane %v2136_v34, 1  ;;  %v1244_v42 = vrot.slane %v1242_v37, 1 }
  0x18   : > { %1955 = vmatmul.msk.bf16.vlgmr.msra.gmra.mxu0 %vm500_vm1, %v352_v31  ;;  %v1247_v43 = vrot.slane %v1245_v38, 2  ;;  %v355_v44 = vor.u32 %v353_v39, %v351_v25  ;;  %v359_v45 = vrot.slane %v357_v40, 1  ;;  %v1251_v52 = vshrl.u32 %v2137_v50, 16  ;;  %v2140_v31 = vld [vmem:[%s2226_s28 + $0x38] sm:$0xff] }
  0x19   : > { %v1240_v35 = vsel %vm1223_vm4, %v1231_v32, %v1239_v33  ;;  %v972_v46 = vsel %vm967_vm2, %v969_v17, %v971_v41  ;;  %v1254_v53 = vshll.u32 %v2137_v50, 16  ;;  %v361_v54 = vshrl.u32 %v2117_v36, 16  ;;  %v2120_v17 = vld [vmem:[%s2226_s28 + $0x28] sm:$0xff]  ;;  %v2121_v32 = vld [vmem:[%s2226_s28 + $0x30] sm:$0xff] }
  0x1a   : > { %2093 = vmatmul.msk.bf16.vlgmr.msra.gmra.mxu3 %vm500_vm1, %v1240_v35  ;;  %v1248_v47 = vor.u32 %v1247_v43, %v1244_v42  ;;  %v360_v48 = vsel %vm340_vm3, %v355_v44, %v359_v45  ;;  %v365_v55 = vshll.u32 %v2118_v51, 16  ;;  %v973_v56 = vrot.slane %v2137_v50, 1 }
  0x1b   : > { %v1253_v57 = vrot.slane %v1251_v52, 1  ;;  %v1256_v58 = vrot.slane %v1254_v53, 2  ;;  %v363_v59 = vor.u32 %v361_v54, %v359_v45  ;;  %v1260_v3 = vshrl.u32 %v2138_v1, 16 }
  0x1c   : > { %v1249_v49 = vsel %vm1223_vm4, %v1239_v33, %v1248_v47  ;;  %v367_v60 = vrot.slane %v365_v55, 1  ;;  %v974_v61 = vsel %vm967_vm2, %v971_v41, %v973_v56  ;;  %v1263_v4 = vshll.u32 %v2138_v1, 16 }
  0x1d   : > { %v1257_v62 = vor.u32 %v1256_v58, %v1253_v57  ;;  %v369_v5 = vshrl.u32 %v2118_v51, 16  ;;  %v373_v6 = vshll.u32 %v2119_v2, 16  ;;  %v975_v7 = vrot.slane %v2138_v1, 1 }
  0x1e   : > { %v368_v63 = vsel %vm340_vm3, %v363_v59, %v367_v60  ;;  %v1262_v8 = vrot.slane %v1260_v3, 1  ;;  %v1265_v9 = vrot.slane %v1263_v4, 2  ;;  %v1269_v18 = vshrl.u32 %v2139_v16, 16 }
  0x1f   : > { %v1258_v0 = vsel %vm1223_vm4, %v1248_v47, %v1257_v62  ;;  %v371_v10 = vor.u32 %v369_v5, %v367_v60  ;;  %v375_v11 = vrot.slane %v373_v6, 1  ;;  %v976_v12 = vsel %vm967_vm2, %v973_v56, %v975_v7  ;;  %v2122_v47 = vld [vmem:[%s2226_s28 + $0x38] sm:$0xff] }
  0x20   : > { %v1272_v19 = vshll.u32 %v2139_v16, 16  ;;  %v377_v20 = vshrl.u32 %v2119_v2, 16  ;;  %v381_v21 = vshll.u32 %v2120_v17, 16  ;;  %v977_v22 = vrot.slane %v2139_v16, 1 }
  0x21   : > { %1976 = vmatmul.msk.bf16.gmra.mxu1 %vm500_vm1, %v2116_v13  ;;  %v1266_v13 = vor.u32 %v1265_v9, %v1262_v8  ;;  %v376_v14 = vsel %vm340_vm3, %v371_v10, %v375_v11  ;;  %v1271_v23 = vrot.slane %v1269_v18, 1  ;;  %v1278_v33 = vshrl.u32 %v2140_v31, 16 }
  0x22   : > { %v1274_v24 = vrot.slane %v1272_v19, 2  ;;  %v379_v25 = vor.u32 %v377_v20, %v375_v11  ;;  %v383_v26 = vrot.slane %v381_v21, 1  ;;  %v978_v27 = vsel %vm967_vm2, %v975_v7, %v977_v22 }
  0x23   : > { %v1267_v15 = vsel %vm1223_vm4, %v1257_v62, %v1266_v13  ;;  %v1281_v34 = vshll.u32 %v2140_v31, 16  ;;  %v385_v35 = vshrl.u32 %v2120_v17, 16  ;;  %v979_v37 = vrot.slane %v2140_v31, 1  ;;  %v2123_v62 = vld [vmem:[%s2226_s28 + $0x40] sm:$0xff]  ;;  %v2311_v31 = vld [vmem:[%s2226_s28 + $0x58] sm:$0xff] }
  0x24   : > { %v1275_v28 = vor.u32 %v1274_v24, %v1271_v23  ;;  %v384_v29 = vsel %vm340_vm3, %v379_v25, %v383_v26  ;;  %v1280_v38 = vrot.slane %v1278_v33, 1  ;;  %v393_v50 = vshrl.u32 %v2121_v32, 16  ;;  %v2315_v33 = vld [vmem:[%s2226_s28 + $0x50] sm:$0xff] }
  0x25   : > { %v1283_v39 = vrot.slane %v1281_v34, 2  ;;  %v387_v40 = vor.u32 %v385_v35, %v383_v26  ;;  %v980_v42 = vsel %vm967_vm2, %v977_v22, %v979_v37  ;;  %v401_v1 = vshrl.u32 %v2122_v47, 16 }
  0x26   : > { %2073 = vmatmul.msk.bf16.gmra.mxu2 %vm500_vm1, %v972_v46  ;;  %v1276_v30 = vsel %vm1223_vm4, %v1266_v13, %v1275_v28  ;;  %v2141_v46 = vld [vmem:[%s2226_s28 + $0x40] sm:$0xff]  ;;  %v2124_v13 = vld [vmem:[%s2226_s28 + $0x48] sm:$0xff]  ;;  %v409_v16 = vshrl.u32 %v2123_v62, 16  ;;  %v1314_v35 = vshrl.u32 %v2311_v31, 16 }
  0x27   : > { %v1284_v43 = vor.u32 %v1283_v39, %v1280_v38  ;;  %v981_v52 = vrot.slane %v2141_v46, 1 }
  0x28   : > { %1956 = vmatmul.msk.bf16.gmra.mxu0 %vm500_vm1, %v360_v48  ;;  %v1287_v48 = vshrl.u32 %v2141_v46, 16 }
  0x29   : > { %v1285_v45 = vsel %vm1223_vm4, %v1275_v28, %v1284_v43  ;;  %v982_v57 = vsel %vm967_vm2, %v979_v37, %v981_v52  ;;  %v2323_v37 = vld [vmem:[%s2653_s2] ss:$0 sm:$0xff] }
  0x2a   : > { %2094 = vmatmul.msk.bf16.gmra.mxu3 %vm500_vm1, %v1249_v49  ;;  %v1290_v49 = vshll.u32 %v2141_v46, 16  ;;  %v1289_v53 = vrot.slane %v1287_v48, 1  ;;  %v1316_v46 = vrot.slane %v1314_v35, 1 }
  0x2c   : > { %v1292_v54 = vrot.slane %v1290_v49, 2 }
  0x2e   : > { %v1293_v58 = vor.u32 %v1292_v54, %v1289_v53 }
  0x30   : > { %v1294_v60 = vsel %vm1223_vm4, %v1284_v43, %v1293_v58  ;;  %v2330_v43 = vld [vmem:[%s2654_s3] ss:$0 sm:$0xff] }
  0x31   : > { %1977 = vmatmul.msk.bf16.gmra.mxu1 %vm500_vm1, %v2117_v36  ;;  %v389_v36 = vshll.u32 %v2121_v32, 16 }
  0x33   : > { %v391_v41 = vrot.slane %v389_v36, 1  ;;  %v1317_v36 = vshll.u32 %v2311_v31, 16 }
  0x35   : > { %v392_v44 = vsel %vm340_vm3, %v387_v40, %v391_v41  ;;  %v395_v55 = vor.u32 %v393_v50, %v391_v41  ;;  %v417_v40 = vshrl.u32 %v2124_v13, 16  ;;  %v421_v41 = vshll.u32 %v2315_v33, 16 }
  0x36   : > { %2074 = vmatmul.msk.bf16.gmra.mxu2 %vm500_vm1, %v974_v61  ;;  %v2142_v61 = vld [vmem:[%s2226_s28 + $0x48] sm:$0xff] }
  0x37   : > { %v983_v3 = vrot.slane %v2142_v61, 1 }
  0x38   : > { %1957 = vmatmul.msk.bf16.gmra.mxu0 %vm500_vm1, %v368_v63  ;;  %v1296_v63 = vshrl.u32 %v2142_v61, 16 }
  0x39   : > { %v984_v8 = vsel %vm967_vm2, %v981_v52, %v983_v3  ;;  %v423_v52 = vrot.slane %v421_v41, 1 }
  0x3a   : > { %2095 = vmatmul.msk.bf16.gmra.mxu3 %vm500_vm1, %v1258_v0  ;;  %v1299_v0 = vshll.u32 %v2142_v61, 16  ;;  %v1298_v4 = vrot.slane %v1296_v63, 1 }
  0x3c   : > { %v1301_v5 = vrot.slane %v1299_v0, 2 }
  0x3e   : > { %v1302_v9 = vor.u32 %v1301_v5, %v1298_v4  ;;  %v2352_v4 = vld [vmem:[%s2226_s28 + $0x58] sm:$0xff] }
  0x40   : > { %v1303_v11 = vsel %vm1223_vm4, %v1293_v58, %v1302_v9 }
  0x41   : > { %1978 = vmatmul.msk.bf16.gmra.mxu1 %vm500_vm1, %v2118_v51  ;;  %v397_v51 = vshll.u32 %v2122_v47, 16 }
  0x43   : > { %v399_v56 = vrot.slane %v397_v51, 1 }
  0x45   : > { %v400_v59 = vsel %vm340_vm3, %v395_v55, %v399_v56  ;;  %v403_v6 = vor.u32 %v401_v1, %v399_v56  ;;  %v2347_v1 = vld [vmem:[%s2226_s28 + $0x60] sm:$0xff] }
  0x46   : > { %2075 = vmatmul.msk.bf16.gmra.mxu2 %vm500_vm1, %v976_v12  ;;  %v2143_v12 = vld [vmem:[%s2226_s28 + $0x50] sm:$0xff] }
  0x47   : > { %v985_v19 = vrot.slane %v2143_v12, 1 }
  0x48   : > { %1958 = vmatmul.msk.bf16.gmra.mxu0 %vm500_vm1, %v376_v14  ;;  %v1305_v14 = vshrl.u32 %v2143_v12, 16 }
  0x49   : > { %v986_v24 = vsel %vm967_vm2, %v983_v3, %v985_v19 }
  0x4a   : > { %2096 = vmatmul.msk.bf16.gmra.mxu3 %vm500_vm1, %v1267_v15  ;;  %v1308_v15 = vshll.u32 %v2143_v12, 16  ;;  %v1307_v20 = vrot.slane %v1305_v14, 1  ;;  %v425_v12 = vshrl.u32 %v2315_v33, 16 }
  0x4c   : > { %v1310_v21 = vrot.slane %v1308_v15, 2 }
  0x4e   : > { %v1311_v25 = vor.u32 %v1310_v21, %v1307_v20 }
  0x51   : > { %1979 = vmatmul.msk.bf16.gmra.mxu1 %vm500_vm1, %v2119_v2  ;;  %v405_v2 = vshll.u32 %v2123_v62, 16 }
  0x53   : > { %v407_v7 = vrot.slane %v405_v2, 1 }
  0x55   : > { %v408_v10 = vsel %vm340_vm3, %v403_v6, %v407_v7  ;;  %v411_v22 = vor.u32 %v409_v16, %v407_v7  ;;  %v1323_v7 = vshrl.u32 %v2347_v1, 16  ;;  %v989_v16 = vrot.slane %v2347_v1, 1 }
  0x56   : > { %2076 = vmatmul.msk.bf16.gmra.mxu2 %vm500_vm1, %v978_v27 }
  0x58   : > { %1959 = vmatmul.msk.bf16.gmra.mxu0 %vm500_vm1, %v384_v29 }
  0x5a   : > { %2097 = vmatmul.msk.bf16.gmra.mxu3 %vm500_vm1, %v1276_v30  ;;  %v1312_v30 = vsel %vm1223_vm4, %v1302_v9, %v1311_v25 }
  0x61   : > { %1980 = vmatmul.msk.bf16.gmra.mxu1 %vm500_vm1, %v2120_v17  ;;  %v413_v17 = vshll.u32 %v2124_v13, 16 }
  0x63   : > { %v415_v23 = vrot.slane %v413_v17, 1  ;;  %v1325_v17 = vrot.slane %v1323_v7, 1 }
  0x65   : > { %v416_v27 = vsel %vm340_vm3, %v411_v22, %v415_v23  ;;  %v419_v51 = vor.u32 %v417_v40, %v415_v23  ;;  %v427_v22 = vor.u32 %v425_v12, %v423_v52  ;;  %v2377_v40 = vld [vmem:[%s2226_s28 + $0x60] sm:$0xff]  ;;  %v2402_v12 = vld [vmem:[%s2226_s28 + $0x68] sm:$0xff] }
  0x66   : > { %2077 = vmatmul.msk.bf16.gmra.mxu2 %vm500_vm1, %v980_v42 }
  0x68   : > { %1960 = vmatmul.msk.bf16.gmra.mxu0 %vm500_vm1, %v392_v44 }
  0x6a   : > { %2098 = vmatmul.msk.bf16.gmra.mxu3 %vm500_vm1, %v1285_v45  ;;  %v987_v45 = vrot.slane %v2311_v31, 1 }
  0x6c   : > { %v988_v54 = vsel %vm967_vm2, %v985_v19, %v987_v45 }
  0x71   : > { %1981 = vmatmul.msk.bf16.gmra.mxu1 %vm500_vm1, %v2121_v32 }
  0x76   : > { %2078 = vmatmul.msk.bf16.gmra.mxu2 %vm500_vm1, %v982_v57 }
  0x78   : > { %1961 = vmatmul.msk.bf16.gmra.mxu0 %vm500_vm1, %v400_v59 }
  0x7a   : > { %2099 = vmatmul.msk.bf16.gmra.mxu3 %vm500_vm1, %v1294_v60  ;;  %v424_v60 = vsel %vm340_vm3, %v419_v51, %v423_v52 }
  0x81   : > { %1982 = vmatmul.msk.bf16.gmra.mxu1 %vm500_vm1, %v2122_v47  ;;  %v1319_v47 = vrot.slane %v1317_v36, 2  ;;  %v2372_v36 = vld [vmem:[%s2226_s28 + $0x68] sm:$0xff] }
  0x83   : > { %v1320_v55 = vor.u32 %v1319_v47, %v1316_v46 }
  0x85   : > { %v1321_v0 = vsel %vm1223_vm4, %v1311_v25, %v1320_v55  ;;  %v990_v25 = vsel %vm967_vm2, %v987_v45, %v989_v16  ;;  %v1335_v45 = vshll.u32 %v2372_v36, 16 }
  0x86   : > { %2079 = vmatmul.msk.bf16.gmra.mxu2 %vm500_vm1, %v984_v8  ;;  %v1326_v8 = vshll.u32 %v2347_v1, 16 }
  0x88   : > { %1962 = vmatmul.msk.bf16.gmra.mxu0 %vm500_vm1, %v408_v10 }
  0x8a   : > { %2100 = vmatmul.msk.bf16.gmra.mxu3 %vm500_vm1, %v1303_v11 }
  0x8e   : > { %v729_v18 = vpop.f32.mrf.mxu1 }
  0x91   : > { %1983 = vmatmul.msk.bf16.gmra.mxu1 %vm500_vm1, %v2123_v62 }
  0x95   : > { %v574_v26 = vpop.f32.mrf.mxu0 }
  0x96   : > { %2080 = vmatmul.msk.bf16.gmra.mxu2 %vm500_vm1, %v986_v24  ;;  %v730_v28 = vadd.f32 %v729_v18, %v574_v26  ;;  %v731_v29 = vpop.f32.mrf.mxu1  ;;  %v1328_v18 = vrot.slane %v1326_v8, 2 }
  0x98   : > { %1963 = vmatmul.msk.bf16.gmra.mxu0 %vm500_vm1, %v416_v27  ;;  %v1329_v26 = vor.u32 %v1328_v18, %v1325_v17 }
  0x99   : > { %v1079_v32 = vpop.f32.mrf.mxu2 }
  0x9a   : > { %v1178_v34 = vadd.f32 %v1079_v32, %v730_v28  ;;  %2101 = vmatmul.msk.bf16.gmra.mxu3 %vm500_vm1, %v1312_v30  ;;  %v1330_v35 = vsel %vm1223_vm4, %v1320_v55, %v1329_v26  ;;  %v1337_v55 = vrot.slane %v1335_v45, 2 }
  0x9d   : > { %v1475_v38 = vpop.f32.mrf.mxu3  ;;  %v576_v39 = vpop.f32.mrf.mxu0 }
  0x9e   : > { %v1574_v42 = vadd.f32 %v1475_v38, %v1178_v34  ;;  %v734_v44 = vpop.f32.mrf.mxu1  ;;  %v732_v49 = vadd.f32 %v731_v29, %v576_v39 }
  0xa0   : > { %v1617_v48 = vadd.f32 %v2323_v37, %v1574_v42 }
  0xa1   : > { %v1081_v50 = vpop.f32.mrf.mxu2  ;;  %1984 = vmatmul.msk.bf16.gmra.mxu1 %vm500_vm1, %v2124_v13  ;;  %v429_v13 = vshll.u32 %v2352_v4, 16 }
  0xa2   : > { %vm1656_vm5 = vcmp.ge.f32.partialorder %v1617_v48, 0.0  ;;  %v1699_v53 = vmul.f32 %v2330_v43, %v1617_v48  ;;  %v1179_v57 = vadd.f32 %v1081_v50, %v732_v49  ;;  %v433_v49 = vshrl.u32 %v2352_v4, 16 }
  0xa3   : > { %v431_v23 = vrot.slane %v429_v13, 1  ;;  %v437_v50 = vshll.u32 %v2377_v40, 16 }
  0xa4   : > { %v1738_v56 = vsel %vm1656_vm5, %v1617_v48, %v1699_v53  ;;  %v991_v53 = vrot.slane %v2372_v36, 1 }
  0xa5   : > { %1777 = vst [vmem:[%s2338_s10] sm:$0xff] %v1738_v56  ;;  %v1477_v58 = vpop.f32.mrf.mxu3  ;;  %v579_v59 = vpop.f32.mrf.mxu0  ;;  %v432_v31 = vsel %vm340_vm3, %v427_v22, %v431_v23 }
  0xa6   : > { %2081 = vmatmul.msk.bf16.gmra.mxu2 %vm500_vm1, %v988_v54  ;;  %v1575_v61 = vadd.f32 %v1477_v58, %v1179_v57  ;;  %v735_v62 = vadd.f32 %v734_v44, %v579_v59  ;;  %v736_v63 = vpop.f32.mrf.mxu1  ;;  %v1332_v44 = vshrl.u32 %v2372_v36, 16  ;;  %v435_v59 = vor.u32 %v433_v49, %v431_v23  ;;  %v2427_v49 = vld [vmem:[%s2226_s28 + $0x70] sm:$0xff] }
  0xa8   : > { %v1618_v2 = vadd.f32 %v2323_v37, %v1575_v61  ;;  %1964 = vmatmul.msk.bf16.gmra.mxu0 %vm500_vm1, %v424_v60  ;;  %v1334_v54 = vrot.slane %v1332_v44, 1  ;;  %v439_v60 = vrot.slane %v437_v50, 1 }
  0xa9   : > { %v1084_v3 = vpop.f32.mrf.mxu2 }
  0xaa   : > { %vm1657_vm6 = vcmp.ge.f32.partialorder %v1618_v2, 0.0  ;;  %v1700_v5 = vmul.f32 %v2330_v43, %v1618_v2  ;;  %v1180_v6 = vadd.f32 %v1084_v3, %v735_v62  ;;  %2102 = vmatmul.msk.bf16.gmra.mxu3 %vm500_vm1, %v1321_v0  ;;  %v992_v62 = vsel %vm967_vm2, %v989_v16, %v991_v53 }
  0xac   : > { %v1739_v9 = vsel %vm1657_vm6, %v1618_v2, %v1700_v5  ;;  %v440_v5 = vsel %vm340_vm3, %v435_v59, %v439_v60 }
  0xad   : > { %1778 = vst [vmem:[%s2338_s10 + $0x8] sm:$0xff] %v1739_v9  ;;  %v1480_v10 = vpop.f32.mrf.mxu3  ;;  %v581_v11 = vpop.f32.mrf.mxu0  ;;  %v2397_v9 = vld [vmem:[%s2226_s28 + $0x70] sm:$0xff] }
  0xae   : > { %v1576_v14 = vadd.f32 %v1480_v10, %v1180_v6  ;;  %v739_v15 = vpop.f32.mrf.mxu1  ;;  %v737_v20 = vadd.f32 %v736_v63, %v581_v11  ;;  %v1338_v63 = vor.u32 %v1337_v55, %v1334_v54  ;;  %v1344_v16 = vshll.u32 %v2397_v9, 16 }
  0xb0   : > { %v1619_v19 = vadd.f32 %v2323_v37, %v1576_v14  ;;  %v1339_v8 = vsel %vm1223_vm4, %v1329_v26, %v1338_v63  ;;  %v1346_v26 = vrot.slane %v1344_v16, 2 }
  0xb1   : > { %v1086_v21 = vpop.f32.mrf.mxu2  ;;  %1985 = vmatmul.msk.bf16.gmra.mxu1 %vm500_vm1, %v2315_v33 }
  0xb2   : > { %vm1658_vm7 = vcmp.ge.f32.partialorder %v1619_v19, 0.0  ;;  %v1701_v24 = vmul.f32 %v2330_v43, %v1619_v19  ;;  %v1181_v28 = vadd.f32 %v1086_v21, %v737_v20  ;;  %v441_v20 = vshrl.u32 %v2377_v40, 16 }
  0xb3   : > { %v445_v21 = vshll.u32 %v2402_v12, 16 }
  0xb4   : > { %v1740_v27 = vsel %vm1658_vm7, %v1619_v19, %v1701_v24  ;;  %v993_v24 = vrot.slane %v2397_v9, 1 }
  0xb5   : > { %1779 = vst [vmem:[%s2338_s10 + $0x10] sm:$0xff] %v1740_v27  ;;  %v1482_v29 = vpop.f32.mrf.mxu3  ;;  %v584_v30 = vpop.f32.mrf.mxu0 }
  0xb6   : > { %2082 = vmatmul.msk.bf16.gmra.mxu2 %vm500_vm1, %v990_v25  ;;  %v1577_v32 = vadd.f32 %v1482_v29, %v1181_v28  ;;  %v740_v33 = vadd.f32 %v739_v15, %v584_v30  ;;  %v741_v34 = vpop.f32.mrf.mxu1  ;;  %v1341_v15 = vshrl.u32 %v2397_v9, 16  ;;  %v443_v30 = vor.u32 %v441_v20, %v439_v60  ;;  %v2452_v20 = vld [vmem:[%s2226_s28 + $0x78] sm:$0xff] }
  0xb8   : > { %v1620_v38 = vadd.f32 %v2323_v37, %v1577_v32  ;;  %1965 = vmatmul.msk.bf16.gmra.mxu0 %vm500_vm1, %v432_v31  ;;  %v1343_v25 = vrot.slane %v1341_v15, 1  ;;  %v447_v31 = vrot.slane %v445_v21, 1 }
  0xb9   : > { %v1089_v39 = vpop.f32.mrf.mxu2 }
  0xba   : > { %vm1659_vm8 = vcmp.ge.f32.partialorder %v1620_v38, 0.0  ;;  %v1702_v41 = vmul.f32 %v2330_v43, %v1620_v38  ;;  %v1182_v42 = vadd.f32 %v1089_v39, %v740_v33  ;;  %2103 = vmatmul.msk.bf16.gmra.mxu3 %vm500_vm1, %v1330_v35  ;;  %v994_v33 = vsel %vm967_vm2, %v991_v53, %v993_v24 }
  0xbc   : > { %v1741_v46 = vsel %vm1659_vm8, %v1620_v38, %v1702_v41  ;;  %v448_v41 = vsel %vm340_vm3, %v443_v30, %v447_v31 }
  0xbd   : > { %1780 = vst [vmem:[%s2338_s10 + $0x18] sm:$0xff] %v1741_v46  ;;  %v1485_v47 = vpop.f32.mrf.mxu3  ;;  %v586_v48 = vpop.f32.mrf.mxu0  ;;  %v2422_v46 = vld [vmem:[%s2226_s28 + $0x78] sm:$0xff] }
  0xbe   : > { %v1578_v51 = vadd.f32 %v1485_v47, %v1182_v42  ;;  %v744_v52 = vpop.f32.mrf.mxu1  ;;  %v742_v57 = vadd.f32 %v741_v34, %v586_v48  ;;  %v1347_v34 = vor.u32 %v1346_v26, %v1343_v25  ;;  %v1353_v53 = vshll.u32 %v2422_v46, 16 }
  0xc0   : > { %v1621_v56 = vadd.f32 %v2323_v37, %v1578_v51  ;;  %v1348_v45 = vsel %vm1223_vm4, %v1338_v63, %v1347_v34  ;;  %v1355_v63 = vrot.slane %v1353_v53, 2 }
  0xc1   : > { %v1091_v58 = vpop.f32.mrf.mxu2  ;;  %1986 = vmatmul.msk.bf16.gmra.mxu1 %vm500_vm1, %v2352_v4 }
  0xc2   : > { %vm1660_vm9 = vcmp.ge.f32.partialorder %v1621_v56, 0.0  ;;  %v1703_v61 = vmul.f32 %v2330_v43, %v1621_v56  ;;  %v1183_v1 = vadd.f32 %v1091_v58, %v742_v57  ;;  %v449_v57 = vshrl.u32 %v2402_v12, 16 }
  0xc3   : > { %v453_v58 = vshll.u32 %v2427_v49, 16 }
  0xc4   : > { %v1742_v0 = vsel %vm1660_vm9, %v1621_v56, %v1703_v61  ;;  %v995_v61 = vrot.slane %v2422_v46, 1 }
  0xc5   : > { %1781 = vst [vmem:[%s2338_s10 + $0x20] sm:$0xff] %v1742_v0  ;;  %v1487_v2 = vpop.f32.mrf.mxu3  ;;  %v589_v3 = vpop.f32.mrf.mxu0 }
  0xc6   : > { %2083 = vmatmul.msk.bf16.gmra.mxu2 %vm500_vm1, %v992_v62  ;;  %v1579_v4 = vadd.f32 %v1487_v2, %v1183_v1  ;;  %v745_v6 = vadd.f32 %v744_v52, %v589_v3  ;;  %v746_v7 = vpop.f32.mrf.mxu1  ;;  %v1350_v52 = vshrl.u32 %v2422_v46, 16  ;;  %v451_v3 = vor.u32 %v449_v57, %v447_v31  ;;  %v2477_v57 = vld [vmem:[%s2226_s28 + $0x80] sm:$0xff] }
  0xc8   : > { %v1622_v10 = vadd.f32 %v2323_v37, %v1579_v4  ;;  %1966 = vmatmul.msk.bf16.gmra.mxu0 %vm500_vm1, %v440_v5  ;;  %v1352_v62 = vrot.slane %v1350_v52, 1  ;;  %v455_v5 = vrot.slane %v453_v58, 1 }
  0xc9   : > { %v1094_v11 = vpop.f32.mrf.mxu2 }
  0xca   : > { %vm1661_vm10 = vcmp.ge.f32.partialorder %v1622_v10, 0.0  ;;  %v1704_v13 = vmul.f32 %v2330_v43, %v1622_v10  ;;  %v1184_v14 = vadd.f32 %v1094_v11, %v745_v6  ;;  %2104 = vmatmul.msk.bf16.gmra.mxu3 %vm500_vm1, %v1339_v8  ;;  %v996_v6 = vsel %vm967_vm2, %v993_v24, %v995_v61 }
  0xcc   : > { %v1743_v17 = vsel %vm1661_vm10, %v1622_v10, %v1704_v13  ;;  %v456_v13 = vsel %vm340_vm3, %v451_v3, %v455_v5 }
  0xcd   : > { %1782 = vst [vmem:[%s2338_s10 + $0x28] sm:$0xff] %v1743_v17  ;;  %v1490_v18 = vpop.f32.mrf.mxu3  ;;  %v591_v19 = vpop.f32.mrf.mxu0  ;;  %v2447_v17 = vld [vmem:[%s2226_s28 + $0x80] sm:$0xff] }
  0xce   : > { %v1580_v22 = vadd.f32 %v1490_v18, %v1184_v14  ;;  %v749_v23 = vpop.f32.mrf.mxu1  ;;  %v747_v28 = vadd.f32 %v746_v7, %v591_v19  ;;  %v1356_v7 = vor.u32 %v1355_v63, %v1352_v62  ;;  %v1362_v24 = vshll.u32 %v2447_v17, 16 }
  0xd0   : > { %v1623_v27 = vadd.f32 %v2323_v37, %v1580_v22  ;;  %v1357_v16 = vsel %vm1223_vm4, %v1347_v34, %v1356_v7  ;;  %v1364_v34 = vrot.slane %v1362_v24, 2 }
  0xd1   : > { %v1096_v29 = vpop.f32.mrf.mxu2  ;;  %1987 = vmatmul.msk.bf16.gmra.mxu1 %vm500_vm1, %v2377_v40 }
  0xd2   : > { %vm1662_vm11 = vcmp.ge.f32.partialorder %v1623_v27, 0.0  ;;  %v1705_v32 = vmul.f32 %v2330_v43, %v1623_v27  ;;  %v1185_v36 = vadd.f32 %v1096_v29, %v747_v28  ;;  %v457_v28 = vshrl.u32 %v2427_v49, 16 }
  0xd3   : > { %v461_v29 = vshll.u32 %v2452_v20, 16 }
  0xd4   : > { %v1744_v35 = vsel %vm1662_vm11, %v1623_v27, %v1705_v32  ;;  %v997_v32 = vrot.slane %v2447_v17, 1 }
  0xd5   : > { %1783 = vst [vmem:[%s2338_s10 + $0x30] sm:$0xff] %v1744_v35  ;;  %v1492_v38 = vpop.f32.mrf.mxu3  ;;  %v594_v39 = vpop.f32.mrf.mxu0 }
  0xd6   : > { %2084 = vmatmul.msk.bf16.gmra.mxu2 %vm500_vm1, %v994_v33  ;;  %v1581_v40 = vadd.f32 %v1492_v38, %v1185_v36  ;;  %v750_v42 = vadd.f32 %v749_v23, %v594_v39  ;;  %v751_v44 = vpop.f32.mrf.mxu1  ;;  %v1359_v23 = vshrl.u32 %v2447_v17, 16  ;;  %v459_v39 = vor.u32 %v457_v28, %v455_v5  ;;  %v2502_v28 = vld [vmem:[%s2226_s28 + $0x88] sm:$0xff] }
  0xd8   : > { %v1624_v47 = vadd.f32 %v2323_v37, %v1581_v40  ;;  %1967 = vmatmul.msk.bf16.gmra.mxu0 %vm500_vm1, %v448_v41  ;;  %v1361_v33 = vrot.slane %v1359_v23, 1  ;;  %v463_v41 = vrot.slane %v461_v29, 1 }
  0xd9   : > { %v1099_v48 = vpop.f32.mrf.mxu2 }
  0xda   : > { %vm1663_vm12 = vcmp.ge.f32.partialorder %v1624_v47, 0.0  ;;  %v1706_v50 = vmul.f32 %v2330_v43, %v1624_v47  ;;  %v1186_v51 = vadd.f32 %v1099_v48, %v750_v42  ;;  %2105 = vmatmul.msk.bf16.gmra.mxu3 %vm500_vm1, %v1348_v45  ;;  %v998_v42 = vsel %vm967_vm2, %v995_v61, %v997_v32 }
  0xdc   : > { %v1745_v54 = vsel %vm1663_vm12, %v1624_v47, %v1706_v50  ;;  %v464_v50 = vsel %vm340_vm3, %v459_v39, %v463_v41 }
  0xdd   : > { %1784 = vst [vmem:[%s2338_s10 + $0x38] sm:$0xff] %v1745_v54  ;;  %v1495_v55 = vpop.f32.mrf.mxu3  ;;  %v596_v56 = vpop.f32.mrf.mxu0  ;;  %v2472_v54 = vld [vmem:[%s2226_s28 + $0x88] sm:$0xff] }
  0xde   : > { %v1582_v59 = vadd.f32 %v1495_v55, %v1186_v51  ;;  %v754_v60 = vpop.f32.mrf.mxu1  ;;  %v752_v1 = vadd.f32 %v751_v44, %v596_v56  ;;  %v1365_v44 = vor.u32 %v1364_v34, %v1361_v33  ;;  %v1371_v61 = vshll.u32 %v2472_v54, 16 }
  0xe0   : > { %v1625_v0 = vadd.f32 %v2323_v37, %v1582_v59  ;;  %v1366_v53 = vsel %vm1223_vm4, %v1356_v7, %v1365_v44  ;;  %v1373_v7 = vrot.slane %v1371_v61, 2 }
  0xe1   : > { %v1101_v2 = vpop.f32.mrf.mxu2  ;;  %1988 = vmatmul.msk.bf16.gmra.mxu1 %vm500_vm1, %v2402_v12 }
  0xe2   : > { %vm1664_vm13 = vcmp.ge.f32.partialorder %v1625_v0, 0.0  ;;  %v1707_v4 = vmul.f32 %v2330_v43, %v1625_v0  ;;  %v1187_v9 = vadd.f32 %v1101_v2, %v752_v1  ;;  %v465_v1 = vshrl.u32 %v2452_v20, 16 }
  0xe3   : > { %v469_v2 = vshll.u32 %v2477_v57, 16 }
  0xe4   : > { %v1746_v8 = vsel %vm1664_vm13, %v1625_v0, %v1707_v4  ;;  %v999_v4 = vrot.slane %v2472_v54, 1 }
  0xe5   : > { %1785 = vst [vmem:[%s2338_s10 + $0x40] sm:$0xff] %v1746_v8  ;;  %v1497_v10 = vpop.f32.mrf.mxu3  ;;  %v599_v11 = vpop.f32.mrf.mxu0 }
  0xe6   : > { %2085 = vmatmul.msk.bf16.gmra.mxu2 %vm500_vm1, %v996_v6  ;;  %v1583_v12 = vadd.f32 %v1497_v10, %v1187_v9  ;;  %v755_v14 = vadd.f32 %v754_v60, %v599_v11  ;;  %v756_v15 = vpop.f32.mrf.mxu1  ;;  %v1368_v60 = vshrl.u32 %v2472_v54, 16  ;;  %v467_v11 = vor.u32 %v465_v1, %v463_v41  ;;  %v2527_v1 = vld [vmem:[%s2226_s28 + $0x90] sm:$0xff] }
  0xe8   : > { %v1626_v18 = vadd.f32 %v2323_v37, %v1583_v12  ;;  %1968 = vmatmul.msk.bf16.gmra.mxu0 %vm500_vm1, %v456_v13  ;;  %v1370_v6 = vrot.slane %v1368_v60, 1  ;;  %v471_v13 = vrot.slane %v469_v2, 1 }
  0xe9   : > { %v1104_v19 = vpop.f32.mrf.mxu2 }
  0xea   : > { %vm1665_vm14 = vcmp.ge.f32.partialorder %v1626_v18, 0.0  ;;  %v1708_v21 = vmul.f32 %v2330_v43, %v1626_v18  ;;  %v1188_v22 = vadd.f32 %v1104_v19, %v755_v14  ;;  %2106 = vmatmul.msk.bf16.gmra.mxu3 %vm500_vm1, %v1357_v16  ;;  %v1000_v14 = vsel %vm967_vm2, %v997_v32, %v999_v4 }
  0xec   : > { %v1747_v25 = vsel %vm1665_vm14, %v1626_v18, %v1708_v21  ;;  %v472_v21 = vsel %vm340_vm3, %v467_v11, %v471_v13 }
  0xed   : > { %1786 = vst [vmem:[%s2338_s10 + $0x48] sm:$0xff] %v1747_v25  ;;  %v1500_v26 = vpop.f32.mrf.mxu3  ;;  %v601_v27 = vpop.f32.mrf.mxu0  ;;  %v2497_v25 = vld [vmem:[%s2226_s28 + $0x90] sm:$0xff] }
  0xee   : > { %v1584_v30 = vadd.f32 %v1500_v26, %v1188_v22  ;;  %v759_v31 = vpop.f32.mrf.mxu1  ;;  %v757_v36 = vadd.f32 %v756_v15, %v601_v27  ;;  %v1374_v15 = vor.u32 %v1373_v7, %v1370_v6  ;;  %v1380_v32 = vshll.u32 %v2497_v25, 16 }
  0xf0   : > { %v1627_v35 = vadd.f32 %v2323_v37, %v1584_v30  ;;  %v1375_v24 = vsel %vm1223_vm4, %v1365_v44, %v1374_v15  ;;  %v1382_v44 = vrot.slane %v1380_v32, 2 }
  0xf1   : > { %v1106_v38 = vpop.f32.mrf.mxu2  ;;  %1989 = vmatmul.msk.bf16.gmra.mxu1 %vm500_vm1, %v2427_v49 }
  0xf2   : > { %vm1666_vm15 = vcmp.ge.f32.partialorder %v1627_v35, 0.0  ;;  %v1709_v40 = vmul.f32 %v2330_v43, %v1627_v35  ;;  %v1189_v46 = vadd.f32 %v1106_v38, %v757_v36  ;;  %v473_v36 = vshrl.u32 %v2477_v57, 16 }
  0xf3   : > { %v477_v38 = vshll.u32 %v2502_v28, 16 }
  0xf4   : > { %v1748_v45 = vsel %vm1666_vm15, %v1627_v35, %v1709_v40  ;;  %v1001_v40 = vrot.slane %v2497_v25, 1 }
  0xf5   : > { %1787 = vst [vmem:[%s2338_s10 + $0x50] sm:$0xff] %v1748_v45  ;;  %v1502_v47 = vpop.f32.mrf.mxu3  ;;  %v604_v48 = vpop.f32.mrf.mxu0 }
  0xf6   : > { %2086 = vmatmul.msk.bf16.gmra.mxu2 %vm500_vm1, %v998_v42  ;;  %v1585_v49 = vadd.f32 %v1502_v47, %v1189_v46  ;;  %v760_v51 = vadd.f32 %v759_v31, %v604_v48  ;;  %v761_v52 = vpop.f32.mrf.mxu1  ;;  %v1377_v31 = vshrl.u32 %v2497_v25, 16  ;;  %v475_v48 = vor.u32 %v473_v36, %v471_v13 }
  0xf8   : > { %v1628_v55 = vadd.f32 %v2323_v37, %v1585_v49  ;;  %1969 = vmatmul.msk.bf16.gmra.mxu0 %vm500_vm1, %v464_v50  ;;  %v1379_v42 = vrot.slane %v1377_v31, 1  ;;  %v479_v50 = vrot.slane %v477_v38, 1 }
  0xf9   : > { %v1109_v56 = vpop.f32.mrf.mxu2 }
  0xfa   : > { %vm1667_vm0 = vcmp.ge.f32.partialorder %v1628_v55, 0.0  ;;  %v1710_v58 = vmul.f32 %v2330_v43, %v1628_v55  ;;  %v1190_v59 = vadd.f32 %v1109_v56, %v760_v51  ;;  %2107 = vmatmul.msk.bf16.gmra.mxu3 %vm500_vm1, %v1366_v53  ;;  %v1002_v51 = vsel %vm967_vm2, %v999_v4, %v1001_v40 }
  0xfc   : > { %v1749_v62 = vsel %vm1667_vm0, %v1628_v55, %v1710_v58  ;;  %v480_v58 = vsel %vm340_vm3, %v475_v48, %v479_v50 }
  0xfd   : > { %1788 = vst [vmem:[%s2338_s10 + $0x58] sm:$0xff] %v1749_v62  ;;  %v1505_v63 = vpop.f32.mrf.mxu3  ;;  %v606_v0 = vpop.f32.mrf.mxu0  ;;  %v2522_v62 = vld [vmem:[%s2226_s28 + $0x98] sm:$0xff] }
  0xfe   : > { %v1586_v3 = vadd.f32 %v1505_v63, %v1190_v59  ;;  %v764_v5 = vpop.f32.mrf.mxu1  ;;  %v762_v9 = vadd.f32 %v761_v52, %v606_v0  ;;  %v1383_v52 = vor.u32 %v1382_v44, %v1379_v42  ;;  %v1389_v4 = vshll.u32 %v2522_v62, 16 }
 0x100   : > { %v1629_v8 = vadd.f32 %v2323_v37, %v1586_v3  ;;  %v1384_v61 = vsel %vm1223_vm4, %v1374_v15, %v1383_v52  ;;  %v1391_v15 = vrot.slane %v1389_v4, 2 }
 0x101   : > { %v1111_v10 = vpop.f32.mrf.mxu2  ;;  %1990 = vmatmul.msk.bf16.gmra.mxu1 %vm500_vm1, %v2452_v20 }
 0x102   : > { %vm1668_vm5 = vcmp.ge.f32.partialorder %v1629_v8, 0.0  ;;  %v1711_v12 = vmul.f32 %v2330_v43, %v1629_v8  ;;  %v1191_v17 = vadd.f32 %v1111_v10, %v762_v9  ;;  %v481_v9 = vshrl.u32 %v2502_v28, 16 }
 0x103   : > { %v485_v10 = vshll.u32 %v2527_v1, 16 }
 0x104   : > { %v1750_v16 = vsel %vm1668_vm5, %v1629_v8, %v1711_v12  ;;  %v1003_v12 = vrot.slane %v2522_v62, 1 }
 0x105   : > { %1789 = vst [vmem:[%s2338_s10 + $0x60] sm:$0xff] %v1750_v16  ;;  %v1507_v18 = vpop.f32.mrf.mxu3  ;;  %v609_v19 = vpop.f32.mrf.mxu0 }
 0x106   : > { %2087 = vmatmul.msk.bf16.gmra.mxu2 %vm500_vm1, %v1000_v14  ;;  %v1587_v20 = vadd.f32 %v1507_v18, %v1191_v17  ;;  %v765_v22 = vadd.f32 %v764_v5, %v609_v19  ;;  %v766_v23 = vpop.f32.mrf.mxu1  ;;  %v1386_v5 = vshrl.u32 %v2522_v62, 16  ;;  %v1217_v19 = vld [vmem:[%s2226_s28 + $0xa0] sm:$0x7] }
 0x108   : > { %v1630_v26 = vadd.f32 %v2323_v37, %v1587_v20  ;;  %1970 = vmatmul.msk.bf16.gmra.mxu0 %vm500_vm1, %v472_v21  ;;  %v1388_v14 = vrot.slane %v1386_v5, 1  ;;  %v483_v21 = vor.u32 %v481_v9, %v479_v50  ;;  %v487_v20 = vrot.slane %v485_v10, 1 }
 0x109   : > { %v1114_v27 = vpop.f32.mrf.mxu2 }
 0x10a   : > { %vm1669_vm6 = vcmp.ge.f32.partialorder %v1630_v26, 0.0  ;;  %v1712_v29 = vmul.f32 %v2330_v43, %v1630_v26  ;;  %v1192_v30 = vadd.f32 %v1114_v27, %v765_v22  ;;  %2108 = vmatmul.msk.bf16.gmra.mxu3 %vm500_vm1, %v1375_v24  ;;  %v239_v24 = vld [vmem:[%s2226_s28 + $0x98] sm:$0x3]  ;;  %v1392_v25 = vor.u32 %v1391_v15, %v1388_v14 }
 0x10b   : > { %v1221_v27 = vunpack.c.l.b16 %v1217_v19 }
 0x10c   : > { %v1751_v33 = vsel %vm1669_vm6, %v1630_v26, %v1712_v29  ;;  %v866_v26 = vld [vmem:[%s2226_s28 + $0xa0] sm:$0x3] }
 0x10d   : > { %1790 = vst [vmem:[%s2338_s10 + $0x68] sm:$0xff] %v1751_v33  ;;  %v1510_v34 = vpop.f32.mrf.mxu3  ;;  %v611_v35 = vpop.f32.mrf.mxu0  ;;  %v319_v33 = vunpack.c.l.b16 %v239_v24  ;;  %v946_v38 = vunpack.c.l.b16 %v866_v26 }
 0x10e   : > { %v1588_v39 = vadd.f32 %v1510_v34, %v1192_v30  ;;  %v769_v41 = vpop.f32.mrf.mxu1  ;;  %v767_v46 = vadd.f32 %v766_v23, %v611_v35  ;;  %v1004_v23 = vsel %vm967_vm2, %v1001_v40, %v1003_v12 }
 0x10f   : > { %v2551_v44 = vpack.c.b16 %v319_v33, %v319_v33 }
 0x110   : > { %v1631_v45 = vadd.f32 %v2323_v37, %v1588_v39  ;;  %v1393_v39 = vsel %vm1223_vm4, %v1383_v52, %v1392_v25 }
 0x111   : > { %v1116_v47 = vpop.f32.mrf.mxu2  ;;  %1991 = vmatmul.msk.bf16.gmra.mxu1 %vm500_vm1, %v2477_v57 }
 0x112   : > { %vm1670_vm7 = vcmp.ge.f32.partialorder %v1631_v45, 0.0  ;;  %v1713_v49 = vmul.f32 %v2330_v43, %v1631_v45  ;;  %v1193_v54 = vadd.f32 %v1116_v47, %v767_v46  ;;  %v2555_v47 = vpack.c.b16 %v946_v38, %v946_v38 }
 0x114   : > { %v1752_v53 = vsel %vm1670_vm7, %v1631_v45, %v1713_v49 }
 0x115   : > { %1791 = vst [vmem:[%s2338_s10 + $0x70] sm:$0xff] %v1752_v53  ;;  %v1512_v55 = vpop.f32.mrf.mxu3  ;;  %v614_v56 = vpop.f32.mrf.mxu0  ;;  %v489_v53 = vshrl.u32 %v2527_v1, 16 }
 0x116   : > { %2088 = vmatmul.msk.bf16.gmra.mxu2 %vm500_vm1, %v1002_v51  ;;  %v1589_v57 = vadd.f32 %v1512_v55, %v1193_v54  ;;  %v770_v59 = vadd.f32 %v769_v41, %v614_v56  ;;  %v771_v60 = vpop.f32.mrf.mxu1  ;;  %v1222_v41 = vpack.c.b16 %v1221_v27, %v1221_v27  ;;  %v493_v54 = vshll.u32 %v2551_v44, 16 }
 0x118   : > { %v1632_v63 = vadd.f32 %v2323_v37, %v1589_v57  ;;  %1971 = vmatmul.msk.bf16.gmra.mxu0 %vm500_vm1, %v480_v58  ;;  %v1395_v48 = vshrl.u32 %v1222_v41, 16  ;;  %v1398_v50 = vshll.u32 %v1222_v41, 16  ;;  %v1005_v58 = vrot.slane %v2555_v47, 1 }
 0x119   : > { %v1119_v0 = vpop.f32.mrf.mxu2 }
 0x11a   : > { %vm1671_vm8 = vcmp.ge.f32.partialorder %v1632_v63, 0.0  ;;  %v1714_v2 = vmul.f32 %v2330_v43, %v1632_v63  ;;  %v1194_v3 = vadd.f32 %v1119_v0, %v770_v59  ;;  %2109 = vmatmul.msk.bf16.gmra.mxu3 %vm500_vm1, %v1384_v61  ;;  %v1397_v57 = vrot.slane %v1395_v48, 1 }
 0x11b   : > { %v1400_v59 = vrot.slane %v1398_v50, 2  ;;  %v495_v0 = vrot.slane %v493_v54, 1 }
 0x11c   : > { %v1753_v6 = vsel %vm1671_vm8, %v1632_v63, %v1714_v2  ;;  %v491_v63 = vor.u32 %v489_v53, %v487_v20 }
 0x11d   : > { %1792 = vst [vmem:[%s2338_s10 + $0x78] sm:$0xff] %v1753_v6  ;;  %v1515_v7 = vpop.f32.mrf.mxu3  ;;  %v616_v8 = vpop.f32.mrf.mxu0  ;;  %v1401_v5 = vor.u32 %v1400_v59, %v1397_v57 }
 0x11e   : > { %v1590_v11 = vadd.f32 %v1515_v7, %v1194_v3  ;;  %v774_v13 = vpop.f32.mrf.mxu1  ;;  %v772_v17 = vadd.f32 %v771_v60, %v616_v8  ;;  %v1006_v3 = vsel %vm967_vm2, %v1003_v12, %v1005_v58  ;;  %v496_v9 = vsel %vm340_vm3, %v491_v63, %v495_v0 }
 0x11f   : > { %v1402_v14 = vsel %vm1223_vm4, %v1392_v25, %v1401_v5 }
 0x120   : > { %v1633_v16 = vadd.f32 %v2323_v37, %v1590_v11 }
 0x121   : > { %v1121_v18 = vpop.f32.mrf.mxu2  ;;  %1992 = vmatmul.msk.bf16.gmra.mxu1 %vm500_vm1, %v2502_v28  ;;  %v488_v28 = vsel %vm340_vm3, %v483_v21, %v487_v20 }
 0x122   : > { %vm1672_vm9 = vcmp.ge.f32.partialorder %v1633_v16, 0.0  ;;  %v1715_v22 = vmul.f32 %v2330_v43, %v1633_v16  ;;  %v1195_v30 = vadd.f32 %v1121_v18, %v772_v17 }
 0x124   : > { %v1754_v29 = vsel %vm1672_vm9, %v1633_v16, %v1715_v22 }
 0x125   : > { %1793 = vst [vmem:[%s2338_s10 + $0x80] sm:$0xff] %v1754_v29  ;;  %v1517_v31 = vpop.f32.mrf.mxu3  ;;  %v619_v32 = vpop.f32.mrf.mxu0  ;;  %v497_v29 = vshrl.u32 %v2551_v44, 16 }
 0x126   : > { %2089 = vmatmul.msk.bf16.gmra.mxu2 %vm500_vm1, %v1004_v23  ;;  %v1591_v34 = vadd.f32 %v1517_v31, %v1195_v30  ;;  %v775_v35 = vadd.f32 %v774_v13, %v619_v32  ;;  %v776_v36 = vpop.f32.mrf.mxu1  ;;  %v237_v13 = vld [vmem:[%s2226_s28 + $0x98] sm:$0x1] }
 0x127   : > { %v674_v16 = vunpack.c.l.b16 %v237_v13 }
 0x128   : > { %v1634_v40 = vadd.f32 %v2323_v37, %v1591_v34  ;;  %1972 = vmatmul.msk.bf16.gmra.mxu0 %vm500_vm1, %v488_v28  ;;  %v499_v28 = vor.u32 %v497_v29, %v495_v0 }
 0x129   : > { %v1124_v42 = vpop.f32.mrf.mxu2  ;;  %v675_v22 = vpack.c.b16 %v674_v16, %v674_v16 }
 0x12a   : > { %vm1673_vm10 = vcmp.ge.f32.partialorder %v1634_v40, 0.0  ;;  %v1716_v45 = vmul.f32 %v2330_v43, %v1634_v40  ;;  %v1196_v46 = vadd.f32 %v1124_v42, %v775_v35  ;;  %2110 = vmatmul.msk.bf16.gmra.mxu3 %vm500_vm1, %v1393_v39 }
 0x12c   : > { %v1755_v49 = vsel %vm1673_vm10, %v1634_v40, %v1716_v45 }
 0x12d   : > { %1794 = vst [vmem:[%s2338_s10 + $0x88] sm:$0xff] %v1755_v49  ;;  %v1520_v51 = vpop.f32.mrf.mxu3  ;;  %v621_v52 = vpop.f32.mrf.mxu0 }
 0x12e   : > { %v1592_v55 = vadd.f32 %v1520_v51, %v1196_v46  ;;  %v779_v56 = vpop.f32.mrf.mxu1  ;;  %v777_v61 = vadd.f32 %v776_v36, %v621_v52 }
 0x130   : > { %v1635_v60 = vadd.f32 %v2323_v37, %v1592_v55 }
 0x131   : > { %v1126_v62 = vpop.f32.mrf.mxu2  ;;  %1993 = vmatmul.msk.bf16.gmra.mxu1 %vm500_vm1, %v2527_v1 }
 0x132   : > { %vm1674_vm11 = vcmp.ge.f32.partialorder %v1635_v60, 0.0  ;;  %v1717_v2 = vmul.f32 %v2330_v43, %v1635_v60  ;;  %v1197_v6 = vadd.f32 %v1126_v62, %v777_v61 }
 0x134   : > { %v1756_v4 = vsel %vm1674_vm11, %v1635_v60, %v1717_v2 }
 0x135   : > { %1795 = vst [vmem:[%s2338_s10 + $0x90] sm:$0xff] %v1756_v4  ;;  %v1522_v7 = vpop.f32.mrf.mxu3  ;;  %v624_v8 = vpop.f32.mrf.mxu0 }
 0x136   : > { %2090 = vmatmul.msk.bf16.gmra.mxu2 %vm500_vm1, %v1006_v3  ;;  %v1593_v1 = vadd.f32 %v1522_v7, %v1197_v6  ;;  %v780_v10 = vadd.f32 %v779_v56, %v624_v8  ;;  %v781_v11 = vpop.f32.mrf.mxu1 }
 0x138   : > { %v1636_v15 = vadd.f32 %v2323_v37, %v1593_v1  ;;  %1973 = vmatmul.msk.bf16.gmra.mxu0 %vm500_vm1, %v496_v9 }
 0x139   : > { %v1129_v12 = vpop.f32.mrf.mxu2 }
 0x13a   : > { %vm1675_vm2 = vcmp.ge.f32.partialorder %v1636_v15, 0.0  ;;  %v1718_v17 = vmul.f32 %v2330_v43, %v1636_v15  ;;  %v1198_v18 = vadd.f32 %v1129_v12, %v780_v10  ;;  %2111 = vmatmul.msk.bf16.gmra.mxu3 %vm500_vm1, %v1402_v14 }
 0x13c   : > { %v1757_v19 = vsel %vm1675_vm2, %v1636_v15, %v1718_v17 }
 0x13d   : > { %1796 = vst [vmem:[%s2338_s10 + $0x98] sm:$0xff] %v1757_v19  ;;  %v1525_v21 = vpop.f32.mrf.mxu3  ;;  %v626_v20 = vpop.f32.mrf.mxu0 }
 0x13e   : > { %v1594_v23 = vadd.f32 %v1525_v21, %v1198_v18  ;;  %v784_v24 = vpop.f32.mrf.mxu1  ;;  %v782_v26 = vadd.f32 %v781_v11, %v626_v20 }
 0x140   : > { %v1637_v25 = vadd.f32 %v2323_v37, %v1594_v23 }
 0x141   : > { %v1131_v27 = vpop.f32.mrf.mxu2  ;;  %1994 = vmatmul.msk.bf16.gmra.mxu1 %vm500_vm1, %v675_v22 }
 0x142   : > { %vm1676_vm3 = vcmp.ge.f32.partialorder %v1637_v25, 0.0  ;;  %v1719_v30 = vmul.f32 %v2330_v43, %v1637_v25  ;;  %v1199_v32 = vadd.f32 %v1131_v27, %v782_v26 }
 0x144   : > { %v1758_v31 = vsel %vm1676_vm3, %v1637_v25, %v1719_v30  ;;  %v2602_v25 = vld [vmem:[%s2653_s2] ss:$0 sm:$0xff] }
 0x145   : > { %1797 = vst [vmem:[%s2338_s10 + $0xa0] sm:$0xff] %v1758_v31  ;;  %v1527_v33 = vpop.f32.mrf.mxu3  ;;  %v629_v34 = vpop.f32.mrf.mxu0 }
 0x146   : > { %2091 = vmatmul.msk.bf16.gmra.mxu2 %vm500_vm1, %v1005_v58  ;;  %v1595_v35 = vadd.f32 %v1527_v33, %v1199_v32  ;;  %v785_v36 = vadd.f32 %v784_v24, %v629_v34  ;;  %v786_v38 = vpop.f32.mrf.mxu1 }
 0x148   : > { %v1638_v39 = vadd.f32 %v2323_v37, %v1595_v35  ;;  %1974 = vmatmul.msk.bf16.gmra.mxu0 %vm500_vm1, %v499_v28 }
 0x149   : > { %v1134_v41 = vpop.f32.mrf.mxu2 }
 0x14a   : > { %vm1677_vm4 = vcmp.ge.f32.partialorder %v1638_v39, 0.0  ;;  %v1720_v40 = vmul.f32 %v2330_v43, %v1638_v39  ;;  %v1200_v42 = vadd.f32 %v1134_v41, %v785_v36  ;;  %2112 = vmatmul.msk.bf16.gmra.mxu3 %vm500_vm1, %v1401_v5 }
 0x14c   : > { %v1759_v44 = vsel %vm1677_vm4, %v1638_v39, %v1720_v40 }
 0x14d   : > { %1798 = vst [vmem:[%s2338_s10 + $0xa8] sm:$0xff] %v1759_v44  ;;  %v1530_v45 = vpop.f32.mrf.mxu3  ;;  %v631_v46 = vpop.f32.mrf.mxu0 }
 0x14e   : > { %v1596_v47 = vadd.f32 %v1530_v45, %v1200_v42  ;;  %v789_v48 = vpop.f32.mrf.mxu1  ;;  %v787_v49 = vadd.f32 %v786_v38, %v631_v46 }
 0x150   : > { %v1639_v50 = vadd.f32 %v2323_v37, %v1596_v47 }
 0x151   : > { %v1136_v51 = vpop.f32.mrf.mxu2 }
 0x152   : > { %vm1678_vm12 = vcmp.ge.f32.partialorder %v1639_v50, 0.0  ;;  %v1721_v52 = vmul.f32 %v2330_v43, %v1639_v50  ;;  %v1201_v54 = vadd.f32 %v1136_v51, %v787_v49 }
 0x154   : > { %v1760_v53 = vsel %vm1678_vm12, %v1639_v50, %v1721_v52 }
 0x155   : > { %1799 = vst [vmem:[%s2338_s10 + $0xb0] sm:$0xff] %v1760_v53  ;;  %v1532_v55 = vpop.f32.mrf.mxu3  ;;  %v634_v56 = vpop.f32.mrf.mxu0 }
 0x156   : > { %v1597_v58 = vadd.f32 %v1532_v55, %v1201_v54  ;;  %v790_v57 = vadd.f32 %v789_v48, %v634_v56  ;;  %v791_v59 = vpop.f32.mrf.mxu1 }
 0x158   : > { %v1640_v60 = vadd.f32 %v2323_v37, %v1597_v58 }
 0x159   : > { %v1139_v61 = vpop.f32.mrf.mxu2 }
 0x15a   : > { %vm1679_vm1 = vcmp.ge.f32.partialorder %v1640_v60, 0.0  ;;  %v1722_v62 = vmul.f32 %v2330_v43, %v1640_v60  ;;  %v1202_v63 = vadd.f32 %v1139_v61, %v790_v57 }
 0x15c   : > { %v1761_v0 = vsel %vm1679_vm1, %v1640_v60, %v1722_v62 }
 0x15d   : > { %1800 = vst [vmem:[%s2338_s10 + $0xb8] sm:$0xff] %v1761_v0  ;;  %v1535_v2 = vpop.f32.mrf.mxu3  ;;  %v636_v3 = vpop.f32.mrf.mxu0 }
 0x15e   : > { %v1598_v5 = vadd.f32 %v1535_v2, %v1202_v63  ;;  %v794_v4 = vpop.f32.mrf.mxu1  ;;  %v792_v7 = vadd.f32 %v791_v59, %v636_v3 }
 0x160   : > { %v1641_v6 = vadd.f32 %v2323_v37, %v1598_v5 }
 0x161   : > { %v1141_v8 = vpop.f32.mrf.mxu2 }
 0x162   : > { %vm1680_vm13 = vcmp.ge.f32.partialorder %v1641_v6, 0.0  ;;  %v1723_v9 = vmul.f32 %v2330_v43, %v1641_v6  ;;  %v1203_v10 = vadd.f32 %v1141_v8, %v792_v7 }
 0x164   : > { %v1762_v1 = vsel %vm1680_vm13, %v1641_v6, %v1723_v9 }
 0x165   : > { %1801 = vst [vmem:[%s2338_s10 + $0xc0] sm:$0xff] %v1762_v1  ;;  %v1537_v11 = vpop.f32.mrf.mxu3  ;;  %v639_v13 = vpop.f32.mrf.mxu0 }
 0x166   : > { %v1599_v14 = vadd.f32 %v1537_v11, %v1203_v10  ;;  %v795_v15 = vadd.f32 %v794_v4, %v639_v13  ;;  %v796_v12 = vpop.f32.mrf.mxu1 }
 0x168   : > { %v1642_v16 = vadd.f32 %v2323_v37, %v1599_v14 }
 0x169   : > { %v1144_v17 = vpop.f32.mrf.mxu2 }
 0x16a   : > { %vm1681_vm14 = vcmp.ge.f32.partialorder %v1642_v16, 0.0  ;;  %v1724_v18 = vmul.f32 %v2330_v43, %v1642_v16  ;;  %v1204_v19 = vadd.f32 %v1144_v17, %v795_v15  ;;  %v2608_v43 = vld [vmem:[%s2654_s3] ss:$0 sm:$0xff] }
 0x16c   : > { %v1763_v21 = vsel %vm1681_vm14, %v1642_v16, %v1724_v18 }
 0x16d   : > { %1802 = vst [vmem:[%s2338_s10 + $0xc8] sm:$0xff] %v1763_v21  ;;  %v1540_v20 = vpop.f32.mrf.mxu3  ;;  %v641_v22 = vpop.f32.mrf.mxu0 }
 0x16e   : > { %v1600_v23 = vadd.f32 %v1540_v20, %v1204_v19  ;;  %v799_v24 = vpop.f32.mrf.mxu1  ;;  %v797_v37 = vadd.f32 %v796_v12, %v641_v22 }
 0x170   : > { %v1643_v26 = vadd.f32 %v2602_v25, %v1600_v23 }
 0x171   : > { %v1146_v27 = vpop.f32.mrf.mxu2 }
 0x172   : > { %vm1682_vm15 = vcmp.ge.f32.partialorder %v1643_v26, 0.0  ;;  %v1725_v29 = vmul.f32 %v2608_v43, %v1643_v26  ;;  %v1205_v31 = vadd.f32 %v1146_v27, %v797_v37 }
 0x174   : > { %v1764_v30 = vsel %vm1682_vm15, %v1643_v26, %v1725_v29 }
 0x175   : > { %1803 = vst [vmem:[%s2338_s10 + $0xd0] sm:$0xff] %v1764_v30  ;;  %v1542_v32 = vpop.f32.mrf.mxu3  ;;  %v644_v28 = vpop.f32.mrf.mxu0 }
 0x176   : > { %v1601_v33 = vadd.f32 %v1542_v32, %v1205_v31  ;;  %v800_v34 = vadd.f32 %v799_v24, %v644_v28  ;;  %v801_v35 = vpop.f32.mrf.mxu1 }
 0x178   : > { %v1644_v36 = vadd.f32 %v2602_v25, %v1601_v33 }
 0x179   : > { %v1149_v38 = vpop.f32.mrf.mxu2 }
 0x17a   : > { %vm1683_vm0 = vcmp.ge.f32.partialorder %v1644_v36, 0.0  ;;  %v1726_v39 = vmul.f32 %v2608_v43, %v1644_v36  ;;  %v1206_v41 = vadd.f32 %v1149_v38, %v800_v34 }
 0x17c   : > { %v1765_v40 = vsel %vm1683_vm0, %v1644_v36, %v1726_v39 }
 0x17d   : > { %1804 = vst [vmem:[%s2338_s10 + $0xd8] sm:$0xff] %v1765_v40  ;;  %v1545_v42 = vpop.f32.mrf.mxu3  ;;  %v646_v44 = vpop.f32.mrf.mxu0 }
 0x17e   : > { %v1602_v45 = vadd.f32 %v1545_v42, %v1206_v41  ;;  %v804_v46 = vpop.f32.mrf.mxu1  ;;  %v802_v48 = vadd.f32 %v801_v35, %v646_v44 }
 0x180   : > { %v1645_v47 = vadd.f32 %v2602_v25, %v1602_v45 }
 0x181   : > { %v1151_v50 = vpop.f32.mrf.mxu2 }
 0x182   : > { %vm1684_vm5 = vcmp.ge.f32.partialorder %v1645_v47, 0.0  ;;  %v1727_v49 = vmul.f32 %v2608_v43, %v1645_v47  ;;  %v1207_v52 = vadd.f32 %v1151_v50, %v802_v48 }
 0x184   : > { %v1766_v51 = vsel %vm1684_vm5, %v1645_v47, %v1727_v49 }
 0x185   : > { %1805 = vst [vmem:[%s2338_s10 + $0xe0] sm:$0xff] %v1766_v51  ;;  %v1547_v53 = vpop.f32.mrf.mxu3  ;;  %v649_v54 = vpop.f32.mrf.mxu0 }
 0x186   : > { %v1603_v55 = vadd.f32 %v1547_v53, %v1207_v52  ;;  %v805_v56 = vadd.f32 %v804_v46, %v649_v54  ;;  %v806_v58 = vpop.f32.mrf.mxu1 }
 0x188   : > { %v1646_v57 = vadd.f32 %v2602_v25, %v1603_v55 }
 0x189   : > { %v1154_v59 = vpop.f32.mrf.mxu2 }
 0x18a   : > { %vm1685_vm6 = vcmp.ge.f32.partialorder %v1646_v57, 0.0  ;;  %v1728_v60 = vmul.f32 %v2608_v43, %v1646_v57  ;;  %v1208_v61 = vadd.f32 %v1154_v59, %v805_v56 }
 0x18c   : > { %v1767_v62 = vsel %vm1685_vm6, %v1646_v57, %v1728_v60 }
 0x18d   : > { %1806 = vst [vmem:[%s2338_s10 + $0xe8] sm:$0xff] %v1767_v62  ;;  %v1550_v63 = vpop.f32.mrf.mxu3  ;;  %v651_v0 = vpop.f32.mrf.mxu0 }
 0x18e   : > { %v1604_v2 = vadd.f32 %v1550_v63, %v1208_v61  ;;  %v809_v3 = vpop.f32.mrf.mxu1  ;;  %v807_v4 = vadd.f32 %v806_v58, %v651_v0 }
 0x190   : > { %v1647_v5 = vadd.f32 %v2602_v25, %v1604_v2 }
 0x191   : > { %v1156_v6 = vpop.f32.mrf.mxu2 }
 0x192   : > { %vm1686_vm7 = vcmp.ge.f32.partialorder %v1647_v5, 0.0  ;;  %v1729_v7 = vmul.f32 %v2608_v43, %v1647_v5  ;;  %v1209_v9 = vadd.f32 %v1156_v6, %v807_v4 }
 0x194   : > { %v1768_v8 = vsel %vm1686_vm7, %v1647_v5, %v1729_v7 }
 0x195   : > { %1807 = vst [vmem:[%s2338_s10 + $0xf0] sm:$0xff] %v1768_v8  ;;  %v1552_v1 = vpop.f32.mrf.mxu3  ;;  %v654_v10 = vpop.f32.mrf.mxu0 }
 0x196   : > { %v1605_v11 = vadd.f32 %v1552_v1, %v1209_v9  ;;  %v810_v13 = vadd.f32 %v809_v3, %v654_v10  ;;  %v811_v14 = vpop.f32.mrf.mxu1 }
 0x198   : > { %v1648_v15 = vadd.f32 %v2602_v25, %v1605_v11 }
 0x199   : > { %v1159_v12 = vpop.f32.mrf.mxu2 }
 0x19a   : > { %vm1687_vm8 = vcmp.ge.f32.partialorder %v1648_v15, 0.0  ;;  %v1730_v16 = vmul.f32 %v2608_v43, %v1648_v15  ;;  %v1210_v17 = vadd.f32 %v1159_v12, %v810_v13 }
 0x19c   : > { %v1769_v18 = vsel %vm1687_vm8, %v1648_v15, %v1730_v16 }
 0x19d   : > { %1808 = vst [vmem:[%s2338_s10 + $0xf8] sm:$0xff] %v1769_v18  ;;  %v1555_v19 = vpop.f32.mrf.mxu3  ;;  %v656_v21 = vpop.f32.mrf.mxu0 }
 0x19e   : > { %v1606_v20 = vadd.f32 %v1555_v19, %v1210_v17  ;;  %v814_v22 = vpop.f32.mrf.mxu1  ;;  %v812_v24 = vadd.f32 %v811_v14, %v656_v21 }
 0x1a0   : > { %v1649_v23 = vadd.f32 %v2602_v25, %v1606_v20 }
 0x1a1   : > { %v1161_v26 = vpop.f32.mrf.mxu2 }
 0x1a2   : > { %vm1688_vm9 = vcmp.ge.f32.partialorder %v1649_v23, 0.0  ;;  %v1731_v37 = vmul.f32 %v2608_v43, %v1649_v23  ;;  %v1211_v29 = vadd.f32 %v1161_v26, %v812_v24 }
 0x1a4   : > { %v1770_v27 = vsel %vm1688_vm9, %v1649_v23, %v1731_v37 }
 0x1a5   : > { %1809 = vst [vmem:[%s2338_s10 + $0x100] sm:$0xff] %v1770_v27  ;;  %v1557_v30 = vpop.f32.mrf.mxu3  ;;  %v659_v31 = vpop.f32.mrf.mxu0 }
 0x1a6   : > { %v1607_v32 = vadd.f32 %v1557_v30, %v1211_v29  ;;  %v815_v28 = vadd.f32 %v814_v22, %v659_v31  ;;  %v816_v33 = vpop.f32.mrf.mxu1 }
 0x1a8   : > { %v1650_v34 = vadd.f32 %v2602_v25, %v1607_v32 }
 0x1a9   : > { %v1164_v35 = vpop.f32.mrf.mxu2 }
 0x1aa   : > { %vm1689_vm10 = vcmp.ge.f32.partialorder %v1650_v34, 0.0  ;;  %v1732_v36 = vmul.f32 %v2608_v43, %v1650_v34  ;;  %v1212_v38 = vadd.f32 %v1164_v35, %v815_v28 }
 0x1ac   : > { %v1771_v39 = vsel %vm1689_vm10, %v1650_v34, %v1732_v36 }
 0x1ad   : > { %1810 = vst [vmem:[%s2338_s10 + $0x108] sm:$0xff] %v1771_v39  ;;  %v1560_v41 = vpop.f32.mrf.mxu3  ;;  %v661_v40 = vpop.f32.mrf.mxu0 }
 0x1ae   : > { %v1608_v42 = vadd.f32 %v1560_v41, %v1212_v38  ;;  %v819_v44 = vpop.f32.mrf.mxu1  ;;  %v817_v46 = vadd.f32 %v816_v33, %v661_v40 }
 0x1b0   : > { %v1651_v45 = vadd.f32 %v2602_v25, %v1608_v42 }
 0x1b1   : > { %v1166_v47 = vpop.f32.mrf.mxu2 }
 0x1b2   : > { %vm1690_vm11 = vcmp.ge.f32.partialorder %v1651_v45, 0.0  ;;  %v1733_v48 = vmul.f32 %v2608_v43, %v1651_v45  ;;  %v1213_v49 = vadd.f32 %v1166_v47, %v817_v46 }
 0x1b4   : > { %v1772_v50 = vsel %vm1690_vm11, %v1651_v45, %v1733_v48 }
 0x1b5   : > { %1811 = vst [vmem:[%s2338_s10 + $0x110] sm:$0xff] %v1772_v50  ;;  %v1562_v51 = vpop.f32.mrf.mxu3  ;;  %v664_v52 = vpop.f32.mrf.mxu0 }
 0x1b6   : > { %v1609_v53 = vadd.f32 %v1562_v51, %v1213_v49  ;;  %v820_v54 = vadd.f32 %v819_v44, %v664_v52  ;;  %v821_v55 = vpop.f32.mrf.mxu1 }
 0x1b8   : > { %v1652_v56 = vadd.f32 %v2602_v25, %v1609_v53 }
 0x1b9   : > { %v1169_v58 = vpop.f32.mrf.mxu2 }
 0x1ba   : > { %vm1691_vm2 = vcmp.ge.f32.partialorder %v1652_v56, 0.0  ;;  %v1734_v57 = vmul.f32 %v2608_v43, %v1652_v56  ;;  %v1214_v59 = vadd.f32 %v1169_v58, %v820_v54 }
 0x1bc   : > { %v1773_v60 = vsel %vm1691_vm2, %v1652_v56, %v1734_v57 }
 0x1bd   : > { %1812 = vst [vmem:[%s2338_s10 + $0x118] sm:$0xff] %v1773_v60  ;;  %v1565_v61 = vpop.f32.mrf.mxu3  ;;  %v666_v62 = vpop.f32.mrf.mxu0 }
 0x1be   : > { %v1610_v63 = vadd.f32 %v1565_v61, %v1214_v59  ;;  %v824_v0 = vpop.f32.mrf.mxu1  ;;  %v822_v3 = vadd.f32 %v821_v55, %v666_v62 }
 0x1c0   : > { %v1653_v2 = vadd.f32 %v2602_v25, %v1610_v63 }
 0x1c1   : > { %v1171_v5 = vpop.f32.mrf.mxu2 }
 0x1c2   : > { %vm1692_vm3 = vcmp.ge.f32.partialorder %v1653_v2, 0.0  ;;  %v1735_v4 = vmul.f32 %v2608_v43, %v1653_v2  ;;  %v1215_v7 = vadd.f32 %v1171_v5, %v822_v3 }
 0x1c4   : > { %v1774_v6 = vsel %vm1692_vm3, %v1653_v2, %v1735_v4 }
 0x1c5   : > { %1813 = vst [vmem:[%s2338_s10 + $0x120] sm:$0xff] %v1774_v6  ;;  %v1567_v8 = vpop.f32.mrf.mxu3  ;;  %v669_v9 = vpop.f32.mrf.mxu0 }
 0x1c6   : > { %v1611_v1 = vadd.f32 %v1567_v8, %v1215_v7  ;;  %v825_v10 = vadd.f32 %v824_v0, %v669_v9  ;;  %v826_v11 = vpop.f32.mrf.mxu1 }
 0x1c8   : > { %v1654_v13 = vadd.f32 %v2602_v25, %v1611_v1 }
 0x1c9   : > { %v1174_v14 = vpop.f32.mrf.mxu2 }
 0x1ca   : > { %vm1693_vm4 = vcmp.ge.f32.partialorder %v1654_v13, 0.0  ;;  %v1736_v15 = vmul.f32 %v2608_v43, %v1654_v13  ;;  %v1216_v12 = vadd.f32 %v1174_v14, %v825_v10 }
 0x1cc   : > { %v1775_v16 = vsel %vm1693_vm4, %v1654_v13, %v1736_v15 }
 0x1cd   : > { %1814 = vst [vmem:[%s2338_s10 + $0x128] sm:$0xff] %v1775_v16  ;;  %v1570_v17 = vpop.f32.mrf.mxu3  ;;  %v671_v18 = vpop.f32.mrf.mxu0 }
 0x1ce   : > { %v1612_v19 = vadd.f32 %v1570_v17, %v1216_v12 }
 0x1d0   : > { %v1655_v21 = vadd.f32 %v2602_v25, %v1612_v19 }
 0x1d1   : > { %v1176_v20 = vpop.f32.mrf.mxu2 }
 0x1d2   : > { %vm1694_vm12 = vcmp.ge.f32.partialorder %v1655_v21, 0.0  ;;  %v1737_v22 = vmul.f32 %v2608_v43, %v1655_v21 }
 0x1d4   : > { %v1776_v23 = vsel %vm1694_vm12, %v1655_v21, %v1737_v22 }
 0x1d5   : > { %1815 = vst [vmem:[%s2338_s10 + $0x130] sm:$0x3] %v1776_v23  ;;  %v1572_v24 = vpop.f32.mrf.mxu3 }
 0x1d6 PF: > { %s14_s15 = sadd.s32 1, %s2173_s15  }
 0x1d7   : > { %p11_p4 = scmp.ge.s32.totalorder %s14_s15, 4  }
 0x1d9   :  { %13 = sbr.rel (!%p11_p4) target bundleno = 1 (0x1), region = 69 }

</bundles_post_ra>
